<compile_context>
chip_gen: v7x
topology: tpu7x:2x2x1
jax: 0.10.0
libtpu: 0.0.40
codegen_flags: <defaults>
</compile_context>

<pallas_src>
import jax
import jax.numpy as jnp
import numpy as np
from jax.experimental import pallas as pl
from jax.experimental.pallas import tpu as pltpu

BN_EPS = 1e-5
H1 = 1024        # fc1 output width
H2 = 512         # fc2 output width (feat)
H3 = 128         # projection head width
LANE = 128


def _bn_fold(h, gamma, beta):
    """Training-mode BatchNorm1d folded into a single FMA pass (f32 math).

    h: (B, C) f32, gamma/beta: (1, C) f32.  Two-pass variance (cheap at small
    B, avoids E[x^2]-mean^2 cancellation); rsqrt goes to the EUP slot."""
    mean = jnp.mean(h, axis=0, keepdims=True)
    var = jnp.mean((h - mean) * (h - mean), axis=0, keepdims=True)
    scale = gamma * jax.lax.rsqrt(var + BN_EPS)
    shift = beta - mean * scale
    return h * scale + shift


def radiomic_encoder_kernel(
    x_ref,      # (B, Fp)       bf16  (features zero-padded to lane multiple)
    w1_ref,     # (Fp, 1024)    bf16
    g1_ref,     # (1, 1024)     f32   bn1 gamma
    b1_ref,     # (1, 1024)     f32   bn1 beta
    w2_ref,     # (1024, 512)   bf16
    w3_ref,     # (512, 128)    bf16
    g3_ref,     # (1, 128)      f32   bn3 gamma
    b3_ref,     # (1, 128)      f32   bn3 beta
    w4_ref,     # (128, 128)    bf16
    feat_ref,   # out (B, 512)  f32
    pj_ref,     # out (B, 128)  f32
):
    # fc1 -> bn1 (full-batch, per-channel stats) -> ReLU.  bf16 MXU operands,
    # f32 accumulation, f32 BN/ReLU math.
    h = jnp.dot(x_ref[...], w1_ref[...], preferred_element_type=jnp.float32)
    h = jnp.maximum(_bn_fold(h, g1_ref[...], b1_ref[...]), 0.0)

    # fc2 -> feat
    feat = jnp.dot(h.astype(jnp.bfloat16), w2_ref[...],
                   preferred_element_type=jnp.float32)
    feat_ref[...] = feat

    # Projection head: Linear(512,128) -> BN -> ReLU -> Linear(128,128)
    p = jnp.dot(feat.astype(jnp.bfloat16), w3_ref[...],
                preferred_element_type=jnp.float32)
    p = jnp.maximum(_bn_fold(p, g3_ref[...], b3_ref[...]), 0.0)
    pj = jnp.dot(p.astype(jnp.bfloat16), w4_ref[...],
                 preferred_element_type=jnp.float32)
    pj_ref[...] = pj.astype(pj_ref.dtype)


def radiomic_encoder(x, params):
    """x: (B, num_features) f32.  params: dict from init_params (f32, linear
    weights stored transposed as (in_features, out_features))."""
    B, F = x.shape
    Fp = ((F + LANE - 1) // LANE) * LANE

    # Host-side prep: lane-align the contraction dim and cast all matmul
    # operands (x + weights) to bf16 -> half the HBM->VMEM traffic and native
    # MXU path.  BN params stay f32.
    x_p = jnp.pad(x, ((0, 0), (0, Fp - F))).astype(jnp.bfloat16)
    w1 = jnp.pad(params["w1"], ((0, Fp - F), (0, 0))).astype(jnp.bfloat16)
    w2 = params["w2"].astype(jnp.bfloat16)
    w3 = params["w3"].astype(jnp.bfloat16)
    w4 = params["w4"].astype(jnp.bfloat16)
    g1, b1 = params["bn1_gamma"], params["bn1_beta"]
    g3, b3 = params["bn3_gamma"], params["bn3_beta"]

    flops = 2 * B * (Fp * H1 + H1 * H2 + H2 * H3 + H3 * H3)
    bytes_accessed = (
        x_p.size * 2
        + (w1.size + w2.size + w3.size + w4.size) * 2
        + (g1.size + b1.size + g3.size + b3.size) * 4
        + B * (H2 + H3) * 4
    )

    # Single-shot: no grid — every operand (≈1.5 MiB bf16) lives whole in VMEM
    # on all generations (v7x 64 MiB included), so no tiling / accumulator.
    return pl.pallas_call(
        radiomic_encoder_kernel,
        out_shape=(
            jax.ShapeDtypeStruct((B, H2), jnp.float32),   # feat
            jax.ShapeDtypeStruct((B, H3), jnp.float32),   # pj_feat
        ),
        compiler_params=pltpu.CompilerParams(
            vmem_limit_bytes=32 * 1024 * 1024,
        ),
        cost_estimate=pl.CostEstimate(
            flops=flops,
            transcendentals=H1 + H3,                      # rsqrt per BN channel
            bytes_accessed=bytes_accessed,
        ),
    )(x_p, w1, g1, b1, w2, w3, g3, b3, w4)


def init_params(key, num_features):
    """Deterministic synthetic parameters matching Radiomic_encoder.__init__
    shapes.  Linear weights are stored transposed: (in_features, out_features)."""
    ks = jax.random.split(key, 8)
    scale = 0.02
    return {
        "w1": scale * jax.random.normal(ks[0], (num_features, H1), jnp.float32),
        "bn1_gamma": 1.0 + 0.1 * jax.random.normal(ks[1], (1, H1), jnp.float32),
        "bn1_beta": 0.1 * jax.random.normal(ks[2], (1, H1), jnp.float32),
        "w2": scale * jax.random.normal(ks[3], (H1, H2), jnp.float32),
        "w3": scale * jax.random.normal(ks[4], (H2, H3), jnp.float32),
        "bn3_gamma": 1.0 + 0.1 * jax.random.normal(ks[5], (1, H3), jnp.float32),
        "bn3_beta": 0.1 * jax.random.normal(ks[6], (1, H3), jnp.float32),
        "w4": scale * jax.random.normal(ks[7], (H3, H3), jnp.float32),
    }


def reference_forward(x, p):
    """Pure-JAX reference mirroring the PyTorch forward (training-mode BN).

    NOTE: this reference uses the same bf16-operand / f32-accumulation matmul
    precision as the kernel so tolerances can stay tight; vs. a true f32
    PyTorch forward the results differ at the ~1e-2 relative level (intended
    precision trade-off)."""
    B, F = x.shape
    Fp = ((F + LANE - 1) // LANE) * LANE
    xb = jnp.pad(x, ((0, 0), (0, Fp - F))).astype(jnp.bfloat16)
    w1 = jnp.pad(p["w1"], ((0, Fp - F), (0, 0))).astype(jnp.bfloat16)
    w2 = p["w2"].astype(jnp.bfloat16)
    w3 = p["w3"].astype(jnp.bfloat16)
    w4 = p["w4"].astype(jnp.bfloat16)

    h = jnp.dot(xb, w1, preferred_element_type=jnp.float32)
    h = jnp.maximum(_bn_fold(h, p["bn1_gamma"], p["bn1_beta"]), 0.0)
    feat = jnp.dot(h.astype(jnp.bfloat16), w2, preferred_element_type=jnp.float32)
    q = jnp.dot(feat.astype(jnp.bfloat16), w3, preferred_element_type=jnp.float32)
    q = jnp.maximum(_bn_fold(q, p["bn3_gamma"], p["bn3_beta"]), 0.0)
    pj = jnp.dot(q.astype(jnp.bfloat16), w4, preferred_element_type=jnp.float32)
    return feat, pj


if __name__ == "__main__":
    key = jax.random.PRNGKey(0)
    k_x, k_p = jax.random.split(key)

    B, num_features = 8, 64
    x = jax.random.normal(k_x, (B, num_features), jnp.float32)
    params = init_params(k_p, num_features)

    feat, pj_feat = radiomic_encoder(x, params)
    feat = jax.block_until_ready(feat)
    pj_feat = jax.block_until_ready(pj_feat)

    feat_ref, pj_ref = reference_forward(x, params)
    assert feat.shape == (B, H2) and pj_feat.shape == (B, H3)
    np.testing.assert_allclose(np.asarray(feat), np.asarray(feat_ref),
                               rtol=5e-3, atol=5e-3)
    np.testing.assert_allclose(np.asarray(pj_feat), np.asarray(pj_ref),
                               rtol=5e-3, atol=5e-3)

    print("KERNEL_OK")
</pallas_src>

<mosaic_0001>
module attributes {stable_mosaic.version = 11 : i64} {
  func.func @radiomic_encoder_kernel(%arg0: memref<8x128xbf16, #tpu.memory_space<vmem>>, %arg1: memref<128x1024xbf16, #tpu.memory_space<vmem>>, %arg2: memref<1x1024xf32, #tpu.memory_space<vmem>>, %arg3: memref<1x1024xf32, #tpu.memory_space<vmem>>, %arg4: memref<1024x512xbf16, #tpu.memory_space<vmem>>, %arg5: memref<512x128xbf16, #tpu.memory_space<vmem>>, %arg6: memref<1x128xf32, #tpu.memory_space<vmem>>, %arg7: memref<1x128xf32, #tpu.memory_space<vmem>>, %arg8: memref<128x128xbf16, #tpu.memory_space<vmem>>, %arg9: memref<8x512xf32, #tpu.memory_space<vmem>>, %arg10: memref<8x128xf32, #tpu.memory_space<vmem>>) attributes {dimension_semantics = [], scalar_prefetch = 0 : i64, scratch_operands = 0 : i64, tpu.core_type = #tpu.core_type<tc>} {
    %c0 = arith.constant 0 : index
    %c0_0 = arith.constant 0 : index
    %0 = vector.load %arg0[%c0, %c0_0] : memref<8x128xbf16, #tpu.memory_space<vmem>>, vector<8x128xbf16>
    %c0_1 = arith.constant 0 : index
    %c0_2 = arith.constant 0 : index
    %1 = vector.load %arg1[%c0_1, %c0_2] : memref<128x1024xbf16, #tpu.memory_space<vmem>>, vector<128x1024xbf16>
    %cst = arith.constant dense<0.000000e+00> : vector<8x1024xf32>
    %2 = tpu.matmul %0, %1, %cst {dimension_numbers = #tpu.dot_dimension_numbers<[1], [0], [0], [1], [0, 0, 1, 1], [], []>} : vector<8x128xbf16>, vector<128x1024xbf16>, vector<8x1024xf32> -> vector<8x1024xf32>
    %c0_3 = arith.constant 0 : index
    %c0_4 = arith.constant 0 : index
    %3 = vector.load %arg2[%c0_3, %c0_4] : memref<1x1024xf32, #tpu.memory_space<vmem>>, vector<1x1024xf32>
    %c0_5 = arith.constant 0 : index
    %c0_6 = arith.constant 0 : index
    %4 = vector.load %arg3[%c0_5, %c0_6] : memref<1x1024xf32, #tpu.memory_space<vmem>>, vector<1x1024xf32>
    %cst_7 = arith.constant dense<0.000000e+00> : vector<1024xf32>
    %5 = vector.multi_reduction <add>, %2, %cst_7 [0] : vector<8x1024xf32> to vector<1024xf32>
    %6 = vector.shape_cast %5 : vector<1024xf32> to vector<1x1024xf32>
    %cst_8 = arith.constant 8.000000e+00 : f32
    %7 = vector.broadcast %cst_8 : f32 to vector<1x1024xf32>
    %8 = arith.divf %6, %7 : vector<1x1024xf32>
    %9 = vector.broadcast %8 : vector<1x1024xf32> to vector<8x1024xf32>
    %10 = arith.subf %2, %9 : vector<8x1024xf32>
    %11 = vector.broadcast %8 : vector<1x1024xf32> to vector<8x1024xf32>
    %12 = arith.subf %2, %11 : vector<8x1024xf32>
    %13 = arith.mulf %10, %12 : vector<8x1024xf32>
    %cst_9 = arith.constant dense<0.000000e+00> : vector<1024xf32>
    %14 = vector.multi_reduction <add>, %13, %cst_9 [0] : vector<8x1024xf32> to vector<1024xf32>
    %15 = vector.shape_cast %14 : vector<1024xf32> to vector<1x1024xf32>
    %cst_10 = arith.constant 8.000000e+00 : f32
    %16 = vector.broadcast %cst_10 : f32 to vector<1x1024xf32>
    %17 = arith.divf %15, %16 : vector<1x1024xf32>
    %cst_11 = arith.constant 9.99999974E-6 : f32
    %18 = vector.broadcast %cst_11 : f32 to vector<1x1024xf32>
    %19 = arith.addf %17, %18 : vector<1x1024xf32>
    %20 = math.rsqrt %19 : vector<1x1024xf32>
    %21 = arith.mulf %3, %20 : vector<1x1024xf32>
    %22 = arith.mulf %8, %21 : vector<1x1024xf32>
    %23 = arith.subf %4, %22 : vector<1x1024xf32>
    %24 = vector.broadcast %21 : vector<1x1024xf32> to vector<8x1024xf32>
    %25 = arith.mulf %2, %24 : vector<8x1024xf32>
    %26 = vector.broadcast %23 : vector<1x1024xf32> to vector<8x1024xf32>
    %27 = arith.addf %25, %26 : vector<8x1024xf32>
    %cst_12 = arith.constant 0.000000e+00 : f32
    %28 = vector.broadcast %cst_12 : f32 to vector<8x1024xf32>
    %29 = arith.maximumf %27, %28 : vector<8x1024xf32>
    %30 = arith.truncf %29 : vector<8x1024xf32> to vector<8x1024xbf16>
    %c0_13 = arith.constant 0 : index
    %c0_14 = arith.constant 0 : index
    %31 = vector.load %arg4[%c0_13, %c0_14] : memref<1024x512xbf16, #tpu.memory_space<vmem>>, vector<1024x512xbf16>
    %cst_15 = arith.constant dense<0.000000e+00> : vector<8x512xf32>
    %32 = tpu.matmul %30, %31, %cst_15 {dimension_numbers = #tpu.dot_dimension_numbers<[1], [0], [0], [1], [0, 0, 1, 1], [], []>} : vector<8x1024xbf16>, vector<1024x512xbf16>, vector<8x512xf32> -> vector<8x512xf32>
    %c0_16 = arith.constant 0 : index
    %c0_17 = arith.constant 0 : index
    %33 = vector.load %arg9[%c0_16, %c0_17] : memref<8x512xf32, #tpu.memory_space<vmem>>, vector<8x512xf32>
    tpu.vector_store %arg9[%c0_16, %c0_17], %32 {strides = array<i32>} : memref<8x512xf32, #tpu.memory_space<vmem>>, vector<8x512xf32>,
    %34 = arith.truncf %32 : vector<8x512xf32> to vector<8x512xbf16>
    %c0_18 = arith.constant 0 : index
    %c0_19 = arith.constant 0 : index
    %35 = vector.load %arg5[%c0_18, %c0_19] : memref<512x128xbf16, #tpu.memory_space<vmem>>, vector<512x128xbf16>
    %cst_20 = arith.constant dense<0.000000e+00> : vector<8x128xf32>
    %36 = tpu.matmul %34, %35, %cst_20 {dimension_numbers = #tpu.dot_dimension_numbers<[1], [0], [0], [1], [0, 0, 1, 1], [], []>} : vector<8x512xbf16>, vector<512x128xbf16>, vector<8x128xf32> -> vector<8x128xf32>
    %c0_21 = arith.constant 0 : index
    %c0_22 = arith.constant 0 : index
    %37 = vector.load %arg6[%c0_21, %c0_22] : memref<1x128xf32, #tpu.memory_space<vmem>>, vector<1x128xf32>
    %c0_23 = arith.constant 0 : index
    %c0_24 = arith.constant 0 : index
    %38 = vector.load %arg7[%c0_23, %c0_24] : memref<1x128xf32, #tpu.memory_space<vmem>>, vector<1x128xf32>
    %cst_25 = arith.constant dense<0.000000e+00> : vector<128xf32>
    %39 = vector.multi_reduction <add>, %36, %cst_25 [0] : vector<8x128xf32> to vector<128xf32>
    %40 = vector.shape_cast %39 : vector<128xf32> to vector<1x128xf32>
    %cst_26 = arith.constant 8.000000e+00 : f32
    %41 = vector.broadcast %cst_26 : f32 to vector<1x128xf32>
    %42 = arith.divf %40, %41 : vector<1x128xf32>
    %43 = vector.broadcast %42 : vector<1x128xf32> to vector<8x128xf32>
    %44 = arith.subf %36, %43 : vector<8x128xf32>
    %45 = vector.broadcast %42 : vector<1x128xf32> to vector<8x128xf32>
    %46 = arith.subf %36, %45 : vector<8x128xf32>
    %47 = arith.mulf %44, %46 : vector<8x128xf32>
    %cst_27 = arith.constant dense<0.000000e+00> : vector<128xf32>
    %48 = vector.multi_reduction <add>, %47, %cst_27 [0] : vector<8x128xf32> to vector<128xf32>
    %49 = vector.shape_cast %48 : vector<128xf32> to vector<1x128xf32>
    %cst_28 = arith.constant 8.000000e+00 : f32
    %50 = vector.broadcast %cst_28 : f32 to vector<1x128xf32>
    %51 = arith.divf %49, %50 : vector<1x128xf32>
    %cst_29 = arith.constant 9.99999974E-6 : f32
    %52 = vector.broadcast %cst_29 : f32 to vector<1x128xf32>
    %53 = arith.addf %51, %52 : vector<1x128xf32>
    %54 = math.rsqrt %53 : vector<1x128xf32>
    %55 = arith.mulf %37, %54 : vector<1x128xf32>
    %56 = arith.mulf %42, %55 : vector<1x128xf32>
    %57 = arith.subf %38, %56 : vector<1x128xf32>
    %58 = vector.broadcast %55 : vector<1x128xf32> to vector<8x128xf32>
    %59 = arith.mulf %36, %58 : vector<8x128xf32>
    %60 = vector.broadcast %57 : vector<1x128xf32> to vector<8x128xf32>
    %61 = arith.addf %59, %60 : vector<8x128xf32>
    %cst_30 = arith.constant 0.000000e+00 : f32
    %62 = vector.broadcast %cst_30 : f32 to vector<8x128xf32>
    %63 = arith.maximumf %61, %62 : vector<8x128xf32>
    %64 = arith.truncf %63 : vector<8x128xf32> to vector<8x128xbf16>
    %c0_31 = arith.constant 0 : index
    %c0_32 = arith.constant 0 : index
    %65 = vector.load %arg8[%c0_31, %c0_32] : memref<128x128xbf16, #tpu.memory_space<vmem>>, vector<128x128xbf16>
    %cst_33 = arith.constant dense<0.000000e+00> : vector<8x128xf32>
    %66 = tpu.matmul %64, %65, %cst_33 {dimension_numbers = #tpu.dot_dimension_numbers<[1], [0], [0], [1], [0, 0, 1, 1], [], []>} : vector<8x128xbf16>, vector<128x128xbf16>, vector<8x128xf32> -> vector<8x128xf32>
    %c0_34 = arith.constant 0 : index
    %c0_35 = arith.constant 0 : index
    %67 = vector.load %arg10[%c0_34, %c0_35] : memref<8x128xf32, #tpu.memory_space<vmem>>, vector<8x128xf32>
    tpu.vector_store %arg10[%c0_34, %c0_35], %66 {strides = array<i32>} : memref<8x128xf32, #tpu.memory_space<vmem>>, vector<8x128xf32>,
    return
  }
}

</mosaic_0001>

<bundles_post_ra>
// kernel: tpu_custom_call.1
= control target key start
LH: loop header
LB: loop body
LE: loop exit
PB: predicated region body
PF: predicated region fallthrough
CT: control target
= control target key end

     0   :  { %16 = vsyncpa [#allocation3], 0  ;;  %s4854_s0 = inlined_call_operand.hbm [shape: bf16[8,128], index: 0, kind: input, shape index: {}]   ;;  %s4855_s1 = inlined_call_operand.hbm [shape: bf16[128,1024], index: 1, kind: input, shape index: {}]   ;;  %s4856_s2 = inlined_call_operand.hbm [shape: f32[1,1024], index: 2, kind: input, shape index: {}]   ;;  %s4857_s3 = inlined_call_operand.vmem [shape: f32[1,1024], index: 3, kind: input, shape index: {}]   ;;  %s4858_s4 = inlined_call_operand.hbm [shape: bf16[1024,512], index: 4, kind: input, shape index: {}]   ;;  %s4859_s5 = inlined_call_operand.hbm [shape: bf16[512,128], index: 5, kind: input, shape index: {}]   ;;  %s4860_s6 = inlined_call_operand.vmem [shape: f32[1,128], index: 6, kind: input, shape index: {}]   ;;  %s4861_s7 = inlined_call_operand.vmem [shape: f32[1,128], index: 7, kind: input, shape index: {}]   ;;  %s4862_s8 = inlined_call_operand.hbm [shape: bf16[128,128], index: 8, kind: input, shape index: {}]   ;;  %s4863_s9 = inlined_call_operand.hbm [shape: f32[8,512], index: 9, kind: output, shape index: {0}]   ;;  %s4864_s10 = inlined_call_operand.hbm [shape: f32[8,128], index: 10, kind: output, shape index: {1}]  }
   0x1   :  { %17 = vsyncpa [#allocation6], 0 }
   0x2   :  { %18 = vsyncpa [#allocation9], 0 }
   0x3   :  { %19 = vsyncpa [#allocation12], 0 }
   0x4   :  { %20 = vsyncpa [#allocation4], 0 }
   0x5   :  { %21 = vsyncpa [#allocation15], 0  ;;  %s4540_s13 = smov [#allocation5]   ;;  %s4352_s17 = scalar_lea.hbm %s4855_s1, 8192 }
   0x6   :  { %s37_s14 = sshll.u32 %s4540_s13, 4  ;;  %p4353_p0 = scmp.ne.s32.totalorder %s4855_s1, %s4352_s17  ;;  %s38_s14 = int_to_ptr.vmem [resolvable:$true] %s37_s14 }
   0x7   :  { %p4356_p1 = scmp.lt.u32.totalorder %s4352_s17, %s4855_s1 }
   0x9   :  { %p4358_p2 = pnand %p4356_p1, %p4353_p0 }
   0xb   :  { %4361 = shalt.err (!%p4358_p2)
}
   0xc   :  { %s4362_s22 = scalar_lea.vmem %s38_s14, 8192  ;;  %p4367_p4 = scmp.lt.s32.totalorder %s38_s14, %s38_s14 }
   0xd   :  { %p4363_p3 = scmp.ne.s32.totalorder %s38_s14, %s4362_s22  ;;  %p4368_p5 = scmp.lt.s32.totalorder %s4362_s22, %s4362_s22 }
   0xf   :  { %p4369_p6 = por %p4368_p5, %p4367_p4 }
  0x11   :  { %p4370_p7 = pnand %p4369_p6, %p4363_p3 }
  0x13   :  { %4373 = shalt.err (!%p4370_p7)
}
  0x14   :  { %s4541_s23 = smov 512   ;;  %s4542_s24 = smov 32  }
  0x15   :  { %43 = dma.hbm_to_vmem [thread:$0]  %s4855_s1, 8192, %s38_s14, [#allocation6], %s4541_s23, %s4541_s23, %s4542_s24  }
  0x16   :  { %s4543_s27 = smov [#allocation8]   ;;  %s4374_s11 = scalar_lea.hbm %s4858_s4, 32768 }
  0x17   :  { %s61_s28 = sshll.u32 %s4543_s27, 4  ;;  %p4375_p8 = scmp.ne.s32.totalorder %s4858_s4, %s4374_s11  ;;  %s62_s28 = int_to_ptr.vmem [resolvable:$true] %s61_s28 }
  0x18   :  { %p4378_p9 = scmp.lt.u32.totalorder %s4374_s11, %s4858_s4 }
  0x1a   :  { %p4380_p10 = pnand %p4378_p9, %p4375_p8 }
  0x1c   :  { %4383 = shalt.err (!%p4380_p10)
}
  0x1d   :  { %s4384_s17 = scalar_lea.vmem %s62_s28, 32768  ;;  %p4389_p12 = scmp.lt.s32.totalorder %s62_s28, %s62_s28 }
  0x1e   :  { %p4385_p11 = scmp.ne.s32.totalorder %s62_s28, %s4384_s17  ;;  %p4390_p13 = scmp.lt.s32.totalorder %s4384_s17, %s4384_s17 }
  0x20   :  { %p4391_p0 = por %p4390_p13, %p4389_p12 }
  0x22   :  { %p4392_p1 = pnand %p4391_p0, %p4385_p11 }
  0x24   :  { %4395 = shalt.err (!%p4392_p1)
}
  0x25   :  { %s4544_s1 = smov 256   ;;  %s4545_s14 = smov 16  }
  0x26   :  { %67 = dma.hbm_to_vmem [thread:$0]  %s4858_s4, 32768, %s62_s28, [#allocation9], %s4544_s1, %s4544_s1, %s4545_s14  }
  0x27   :  { %s4546_s20 = smov [#allocation2]   ;;  %s4547_s22 = smov [#allocation7]  }
  0x28   :  { %s28_s21 = sshll.u32 %s4546_s20, 4  ;;  %s50_s23 = sshll.u32 %s4547_s22, 4  ;;  %s29_s21 = int_to_ptr.vmem [resolvable:$true] %s28_s21  ;;  %s51_s23 = int_to_ptr.vmem [resolvable:$true] %s50_s23 }
  0x29   :  { %s4396_s26 = scalar_lea.hbm %s4854_s0, 64 }
  0x2a   :  { %p4397_p2 = scmp.ne.s32.totalorder %s4854_s0, %s4396_s26  ;;  %p4400_p3 = scmp.lt.u32.totalorder %s4396_s26, %s4854_s0 }
  0x2c   :  { %p4402_p4 = pnand %p4400_p3, %p4397_p2 }
  0x2e   :  { %4405 = shalt.err (!%p4402_p4)
}
  0x2f   :  { %s4406_s4 = scalar_lea.vmem %s29_s21, 64  ;;  %p4411_p6 = scmp.lt.s32.totalorder %s29_s21, %s29_s21 }
  0x30   :  { %p4407_p5 = scmp.ne.s32.totalorder %s29_s21, %s4406_s4  ;;  %p4412_p7 = scmp.lt.s32.totalorder %s4406_s4, %s4406_s4 }
  0x32   :  { %p4413_p8 = por %p4412_p7, %p4411_p6 }
  0x34   :  { %p4414_p9 = pnand %p4413_p8, %p4407_p5 }
  0x36   :  { %4417 = shalt.err (!%p4414_p9)
}
  0x37   :  { %31 = dma.hbm_to_vmem [thread:$0]  %s4854_s0, 64, %s29_s21, [#allocation3]  }
  0x38   :  { %s4418_s16 = scalar_lea.hbm %s4856_s2, 128 }
  0x39   :  { %p4419_p10 = scmp.ne.s32.totalorder %s4856_s2, %s4418_s16  ;;  %p4422_p11 = scmp.lt.u32.totalorder %s4418_s16, %s4856_s2 }
  0x3b   :  { %p4424_p12 = pnand %p4422_p11, %p4419_p10 }
  0x3d   :  { %4427 = shalt.err (!%p4424_p12)
}
  0x3e   :  { %s4428_s19 = scalar_lea.vmem %s51_s23, 128  ;;  %p4433_p0 = scmp.lt.s32.totalorder %s51_s23, %s51_s23 }
  0x3f   :  { %p4429_p13 = scmp.ne.s32.totalorder %s51_s23, %s4428_s19  ;;  %p4434_p1 = scmp.lt.s32.totalorder %s4428_s19, %s4428_s19 }
  0x41   :  { %p4435_p2 = por %p4434_p1, %p4433_p0 }
  0x43   :  { %p4436_p3 = pnand %p4435_p2, %p4429_p13 }
  0x45   :  { %4439 = shalt.err (!%p4436_p3)
}
  0x46   :  { %53 = dma.hbm_to_vmem [thread:$0]  %s4856_s2, 128, %s51_s23, [#allocation6]  }
  0x47   :  { %s4548_s21 = smov [#allocation10]   ;;  %s4440_s26 = scalar_lea.hbm %s4859_s5, 4096 }
  0x48   :  { %s73_s22 = sshll.u32 %s4548_s21, 4  ;;  %p4441_p4 = scmp.ne.s32.totalorder %s4859_s5, %s4440_s26  ;;  %s74_s22 = int_to_ptr.vmem [resolvable:$true] %s73_s22 }
  0x49   :  { %p4444_p5 = scmp.lt.u32.totalorder %s4440_s26, %s4859_s5 }
  0x4b   :  { %p4446_p6 = pnand %p4444_p5, %p4441_p4 }
  0x4d   :  { %4449 = shalt.err (!%p4446_p6)
}
  0x4e   :  { %s4450_s4 = scalar_lea.vmem %s74_s22, 4096  ;;  %p4455_p8 = scmp.lt.s32.totalorder %s74_s22, %s74_s22 }
  0x4f   :  { %p4451_p7 = scmp.ne.s32.totalorder %s74_s22, %s4450_s4  ;;  %p4456_p9 = scmp.lt.s32.totalorder %s4450_s4, %s4450_s4 }
  0x51   :  { %p4457_p10 = por %p4456_p9, %p4455_p8 }
  0x53   :  { %p4458_p11 = pnand %p4457_p10, %p4451_p7 }
  0x55   :  { %4461 = shalt.err (!%p4458_p11)
}
  0x56   :  { %s4549_s2 = smov 64   ;;  %s4550_s23 = smov 4  }
  0x57   :  { %79 = dma.hbm_to_vmem [thread:$0]  %s4859_s5, 4096, %s74_s22, [#allocation9], %s4549_s2, %s4549_s2, %s4550_s23  }
  0x58   :  { %s4551_s13 = smov [#allocation11]   ;;  %s4462_s1 = scalar_lea.hbm %s4862_s8, 1024 }
  0x59   :  { %s89_s15 = sshll.u32 %s4551_s13, 4  ;;  %p4463_p12 = scmp.ne.s32.totalorder %s4862_s8, %s4462_s1  ;;  %s90_s15 = int_to_ptr.vmem [resolvable:$true] %s89_s15 }
  0x5a   :  { %p4466_p13 = scmp.lt.u32.totalorder %s4462_s1, %s4862_s8 }
  0x5c   :  { %p4468_p0 = pnand %p4466_p13, %p4463_p12 }
  0x5e   :  { %4471 = shalt.err (!%p4468_p0)
}
  0x5f   :  { %s4472_s20 = scalar_lea.vmem %s90_s15, 1024  ;;  %p4477_p2 = scmp.lt.s32.totalorder %s90_s15, %s90_s15 }
  0x60   :  { %p4473_p1 = scmp.ne.s32.totalorder %s90_s15, %s4472_s20  ;;  %p4478_p3 = scmp.lt.s32.totalorder %s4472_s20, %s4472_s20 }
  0x62   :  { %p4479_p4 = por %p4478_p3, %p4477_p2 }
  0x64   :  { %p4480_p5 = pnand %p4479_p4, %p4473_p1 }
  0x66   :  { %4483 = shalt.err (!%p4480_p5)
}
  0x67   :  { %95 = dma.hbm_to_vmem [thread:$0]  %s4862_s8, 1024, %s90_s15, [#allocation12], %s4549_s2, %s4549_s2, %s4550_s23  }
  0x68   :  { %4528 = dma.done.wait [#allocation3], 64  }
  0x69   :  { %4529 = vsyncadd [#allocation3], 4294967232 }
  0x6a   :  { %4530 = dma.done.wait [#allocation6], 8320  }
  0x6b   :  { %4531 = vsyncadd [#allocation6], 4294958976 }
  0x6c   :  { %4532 = dma.done.wait [#allocation9], 36864  }
  0x6d   :  { %4533 = vsyncadd [#allocation9], 4294930432 }
  0x6e   :  { %4534 = dma.done.wait [#allocation12], 1024  }
  0x6f   :  { %4535 = vsyncadd [#allocation12], 4294966272  ;;  %v4552_v0 = vmov 0   ;;  %v116_v1 = vld [vmem:[#allocation5] sm:$0xff]  ;;  %v117_v3 = vld [vmem:[#allocation5 + $0x8] sm:$0xff]  ;;  %vm4555_vm0 = vmmov 0  }
  0x70   :  { %532 = vmatprep.mubr.bf16.mxu0 %v4552_v0  ;;  %573 = vmatprep.mubr.bf16.mxu1 %v4552_v0  ;;  %v120_v2 = vld [vmem:[#allocation5 + $0x20] sm:$0xff]  ;;  %v121_v5 = vld [vmem:[#allocation5 + $0x28] sm:$0xff]  ;;  %v118_v60 = vld [vmem:[#allocation5 + $0x10] sm:$0xff]  ;;  %s4556_s27 = smov [#allocation13]  }
  0x71   :  { %v3436_v4 = vcombine.high %v116_v1, %v120_v2  ;;  %v3435_v6 = vcombine.low %v116_v1, %v120_v2  ;;  %v124_v7 = vld [vmem:[#allocation5 + $0x40] sm:$0xff]  ;;  %v3438_v9 = vcombine.high %v117_v3, %v121_v5  ;;  %v3437_v10 = vcombine.low %v117_v3, %v121_v5  ;;  %v125_v12 = vld [vmem:[#allocation5 + $0x48] sm:$0xff]  ;;  %v122_v61 = vld [vmem:[#allocation5 + $0x30] sm:$0xff]  ;;  %s3409_s29 = sshll.u32 %s4556_s27, 4  ;;  %s3410_s29 = int_to_ptr.vmem [resolvable:$true] %s3409_s29 }
  0x72   :  { %v128_v8 = vld [vmem:[#allocation5 + $0x60] sm:$0xff]  ;;  %v129_v13 = vld [vmem:[#allocation5 + $0x68] sm:$0xff]  ;;  %v119_v1 = vld [vmem:[#allocation5 + $0x18] sm:$0xff]  ;;  %p4489_p7 = scmp.lt.s32.totalorder %s3410_s29, %s3410_s29 }
  0x73   :  { %v3444_v11 = vcombine.high %v124_v7, %v128_v8  ;;  %v132_v14 = vld [vmem:[#allocation5 + $0x80] sm:$0xff]  ;;  %500 = vmatprep.subr.bf16.mxu0 %v3436_v4  ;;  %v3446_v15 = vcombine.high %v125_v12, %v129_v13  ;;  %v133_v17 = vld [vmem:[#allocation5 + $0x88] sm:$0xff]  ;;  %541 = vmatprep.subr.bf16.mxu1 %v3438_v9  ;;  %v3443_v19 = vcombine.low %v124_v7, %v128_v8  ;;  %v123_v2 = vld [vmem:[#allocation5 + $0x38] sm:$0xff] }
  0x74   :  { %v136_v16 = vld [vmem:[#allocation5 + $0xa0] sm:$0xff]  ;;  %v137_v18 = vld [vmem:[#allocation5 + $0xa8] sm:$0xff]  ;;  %501 = vmatpush1.bf16.msra.mxu0 %v3435_v6  ;;  %542 = vmatpush1.bf16.msra.mxu1 %v3437_v10  ;;  %v3445_v20 = vcombine.low %v125_v12, %v129_v13  ;;  %v126_v5 = vld [vmem:[#allocation5 + $0x50] sm:$0xff]  ;;  %v3440_v8 = vcombine.high %v118_v60, %v122_v61  ;;  %v3442_v12 = vcombine.high %v119_v1, %v123_v2 }
  0x75   :  { %502 = vmatprep.subr.bf16.mxu0 %v3444_v11  ;;  %v3452_v21 = vcombine.high %v132_v14, %v136_v16  ;;  %543 = vmatprep.subr.bf16.mxu1 %v3446_v15  ;;  %v3454_v22 = vcombine.high %v133_v17, %v137_v18  ;;  %v140_v23 = vld [vmem:[#allocation5 + $0xc0] sm:$0xff]  ;;  %v141_v25 = vld [vmem:[#allocation5 + $0xc8] sm:$0xff]  ;;  %v3451_v27 = vcombine.low %v132_v14, %v136_v16  ;;  %v130_v6 = vld [vmem:[#allocation5 + $0x70] sm:$0xff] }
  0x76   :  { %v144_v24 = vld [vmem:[#allocation5 + $0xe0] sm:$0xff]  ;;  %v145_v26 = vld [vmem:[#allocation5 + $0xe8] sm:$0xff]  ;;  %v3453_v28 = vcombine.low %v133_v17, %v137_v18  ;;  %v127_v9 = vld [vmem:[#allocation5 + $0x58] sm:$0xff]  ;;  %v3439_v13 = vcombine.low %v118_v60, %v122_v61  ;;  %v3441_v16 = vcombine.low %v119_v1, %v123_v2  ;;  %v3448_v17 = vcombine.high %v126_v5, %v130_v6 }
  0x77   :  { %v3460_v29 = vcombine.high %v140_v23, %v144_v24  ;;  %v3462_v30 = vcombine.high %v141_v25, %v145_v26  ;;  %v148_v31 = vld [vmem:[#allocation5 + $0x100] sm:$0xff]  ;;  %v149_v33 = vld [vmem:[#allocation5 + $0x108] sm:$0xff]  ;;  %v3459_v35 = vcombine.low %v140_v23, %v144_v24  ;;  %v3461_v36 = vcombine.low %v141_v25, %v145_v26  ;;  %v131_v10 = vld [vmem:[#allocation5 + $0x78] sm:$0xff] }
  0x78   :  { %503 = vmatpush1.bf16.msra.mxu0 %v3443_v19  ;;  %544 = vmatpush1.bf16.msra.mxu1 %v3445_v20  ;;  %v152_v32 = vld [vmem:[#allocation5 + $0x120] sm:$0xff]  ;;  %v153_v34 = vld [vmem:[#allocation5 + $0x128] sm:$0xff]  ;;  %v4687_v11 = vld [vmem:[#allocation2] sm:$0xf]  ;;  %v3450_v20 = vcombine.high %v127_v9, %v131_v10  ;;  %v3449_v24 = vcombine.low %v127_v9, %v131_v10 }
  0x79   :  { %504 = vmatprep.subr.bf16.mxu0 %v3452_v21  ;;  %545 = vmatprep.subr.bf16.mxu1 %v3454_v22  ;;  %v3468_v37 = vcombine.high %v148_v31, %v152_v32  ;;  %v3470_v38 = vcombine.high %v149_v33, %v153_v34  ;;  %v156_v39 = vld [vmem:[#allocation5 + $0x140] sm:$0xff]  ;;  %v157_v41 = vld [vmem:[#allocation5 + $0x148] sm:$0xff]  ;;  %v3467_v43 = vcombine.low %v148_v31, %v152_v32  ;;  %v134_v14 = vld [vmem:[#allocation5 + $0x90] sm:$0xff] }
  0x7a   :  { %v160_v40 = vld [vmem:[#allocation5 + $0x160] sm:$0xff]  ;;  %v161_v42 = vld [vmem:[#allocation5 + $0x168] sm:$0xff]  ;;  %v3469_v44 = vcombine.low %v149_v33, %v153_v34  ;;  %v138_v15 = vld [vmem:[#allocation5 + $0xb0] sm:$0xff]  ;;  %v3447_v21 = vcombine.low %v126_v5, %v130_v6 }
  0x7b   :  { %v3476_v45 = vcombine.high %v156_v39, %v160_v40  ;;  %v3478_v46 = vcombine.high %v157_v41, %v161_v42  ;;  %v164_v47 = vld [vmem:[#allocation5 + $0x180] sm:$0xff]  ;;  %v165_v49 = vld [vmem:[#allocation5 + $0x188] sm:$0xff]  ;;  %v3475_v51 = vcombine.low %v156_v39, %v160_v40  ;;  %v3477_v54 = vcombine.low %v157_v41, %v161_v42  ;;  %v135_v18 = vld [vmem:[#allocation5 + $0x98] sm:$0xff] }
  0x7c   :  { %505 = vmatpush1.bf16.msra.mxu0 %v3451_v27  ;;  %546 = vmatpush1.bf16.msra.mxu1 %v3453_v28  ;;  %v168_v48 = vld [vmem:[#allocation5 + $0x1a0] sm:$0xff]  ;;  %v169_v50 = vld [vmem:[#allocation5 + $0x1a8] sm:$0xff]  ;;  %v139_v19 = vld [vmem:[#allocation5 + $0xb8] sm:$0xff]  ;;  %v3456_v25 = vcombine.high %v134_v14, %v138_v15 }
  0x7d   :  { %506 = vmatprep.subr.bf16.mxu0 %v3460_v29  ;;  %547 = vmatprep.subr.bf16.mxu1 %v3462_v30  ;;  %v172_v52 = vld [vmem:[#allocation5 + $0x1c0] sm:$0xff]  ;;  %v3484_v55 = vcombine.high %v164_v47, %v168_v48  ;;  %v173_v56 = vld [vmem:[#allocation5 + $0x1c8] sm:$0xff]  ;;  %v3486_v58 = vcombine.high %v165_v49, %v169_v50  ;;  %v3483_v59 = vcombine.low %v164_v47, %v168_v48  ;;  %v142_v22 = vld [vmem:[#allocation5 + $0xd0] sm:$0xff] }
  0x7e   :  { %v176_v53 = vld [vmem:[#allocation5 + $0x1e0] sm:$0xff]  ;;  %v177_v57 = vld [vmem:[#allocation5 + $0x1e8] sm:$0xff]  ;;  %v3485_v62 = vcombine.low %v165_v49, %v169_v50  ;;  %v146_v23 = vld [vmem:[#allocation5 + $0xf0] sm:$0xff]  ;;  %v3458_v28 = vcombine.high %v135_v18, %v139_v19  ;;  %v3455_v29 = vcombine.low %v134_v14, %v138_v15  ;;  %v3457_v32 = vcombine.low %v135_v18, %v139_v19 }
  0x7f   :  { %v3492_v63 = vcombine.high %v172_v52, %v176_v53  ;;  %v3494_v3 = vcombine.high %v173_v56, %v177_v57  ;;  %v3491_v4 = vcombine.low %v172_v52, %v176_v53  ;;  %v3493_v7 = vcombine.low %v173_v56, %v177_v57  ;;  %v143_v26 = vld [vmem:[#allocation5 + $0xd8] sm:$0xff]  ;;  %v150_v30 = vld [vmem:[#allocation5 + $0x110] sm:$0xff] }
  0x80   :  { %507 = vmatpush1.bf16.msra.mxu0 %v3459_v35  ;;  %548 = vmatpush1.bf16.msra.mxu1 %v3461_v36  ;;  %v147_v27 = vld [vmem:[#allocation5 + $0xf8] sm:$0xff]  ;;  %v154_v31 = vld [vmem:[#allocation5 + $0x130] sm:$0xff]  ;;  %v3464_v33 = vcombine.high %v142_v22, %v146_v23 }
  0x81   :  { %508 = vmatprep.subr.bf16.mxu0 %v3468_v37  ;;  %549 = vmatprep.subr.bf16.mxu1 %v3470_v38  ;;  %v151_v34 = vld [vmem:[#allocation5 + $0x118] sm:$0xff]  ;;  %v3466_v36 = vcombine.high %v143_v26, %v147_v27  ;;  %v3463_v37 = vcombine.low %v142_v22, %v146_v23  ;;  %v158_v38 = vld [vmem:[#allocation5 + $0x150] sm:$0xff]  ;;  %v3465_v40 = vcombine.low %v143_v26, %v147_v27 }
  0x82   :  { %v155_v35 = vld [vmem:[#allocation5 + $0x138] sm:$0xff]  ;;  %v162_v39 = vld [vmem:[#allocation5 + $0x170] sm:$0xff] }
  0x83   :  { %v159_v41 = vld [vmem:[#allocation5 + $0x158] sm:$0xff]  ;;  %v3473_v47 = vcombine.low %v151_v34, %v155_v35  ;;  %v3480_v48 = vcombine.high %v158_v38, %v162_v39  ;;  %v3479_v52 = vcombine.low %v158_v38, %v162_v39  ;;  %v174_v53 = vld [vmem:[#allocation5 + $0x1d0] sm:$0xff] }
  0x84   :  { %509 = vmatpush1.bf16.msra.mxu0 %v3467_v43  ;;  %550 = vmatpush1.bf16.msra.mxu1 %v3469_v44  ;;  %v163_v42 = vld [vmem:[#allocation5 + $0x178] sm:$0xff]  ;;  %v3474_v43 = vcombine.high %v151_v34, %v155_v35  ;;  %v3471_v44 = vcombine.low %v150_v30, %v154_v31  ;;  %v3913_v6 = vld [vmem:[#allocation8 + $0x8] ss:$16 sps:$4 sm:$0xff]  }
  0x85   :  { %510 = vmatprep.subr.bf16.mxu0 %v3476_v45  ;;  %551 = vmatprep.subr.bf16.mxu1 %v3478_v46  ;;  %v166_v45 = vld [vmem:[#allocation5 + $0x190] sm:$0xff]  ;;  %v167_v49 = vld [vmem:[#allocation5 + $0x198] sm:$0xff] }
  0x86   :  { %v170_v46 = vld [vmem:[#allocation5 + $0x1b0] sm:$0xff]  ;;  %v171_v50 = vld [vmem:[#allocation5 + $0x1b8] sm:$0xff] }
  0x87   :  { %v3488_v56 = vcombine.high %v166_v45, %v170_v46  ;;  %v175_v57 = vld [vmem:[#allocation5 + $0x1d8] sm:$0xff]  ;;  %v3487_v60 = vcombine.low %v166_v45, %v170_v46  ;;  %v3489_v61 = vcombine.low %v167_v49, %v171_v50  ;;  %v3919_v10 = vld [vmem:[#allocation8 + $0x28] ss:$16 sps:$4 sm:$0xff]  }
  0x88   :  { %511 = vmatpush1.bf16.msra.mxu0 %v3475_v51  ;;  %552 = vmatpush1.bf16.msra.mxu1 %v3477_v54  ;;  %v3482_v51 = vcombine.high %v159_v41, %v163_v42  ;;  %v178_v54 = vld [vmem:[#allocation5 + $0x1f0] sm:$0xff]  ;;  %v3910_v5 = vld [vmem:[#allocation8] ss:$16 sps:$4 sm:$0xff]   ;;  %v3930_v15 = vld [vmem:[#allocation8 + $0x64] ss:$16 sps:$4 sm:$0xff]  }
  0x89   :  { %512 = vmatprep.subr.bf16.mxu0 %v3484_v55  ;;  %553 = vmatprep.subr.bf16.mxu1 %v3486_v58  ;;  %v3481_v55 = vcombine.low %v159_v41, %v163_v42  ;;  %v179_v58 = vld [vmem:[#allocation5 + $0x1f8] sm:$0xff]  ;;  %v3495_v1 = vcombine.low %v174_v53, %v178_v54  ;;  %v3931_v18 = vld [vmem:[#allocation8 + $0x68] ss:$16 sps:$4 sm:$0xff]  }
  0x8a   :  { %v3497_v2 = vcombine.low %v175_v57, %v179_v58  ;;  %v3916_v9 = vld [vmem:[#allocation8 + $0x20] ss:$16 sps:$4 sm:$0xff]   ;;  %v3936_v19 = vld [vmem:[#allocation8 + $0x84] ss:$16 sps:$4 sm:$0xff]   ;;  %v3937_v22 = vld [vmem:[#allocation8 + $0x88] ss:$16 sps:$4 sm:$0xff]  }
  0x8b   :  { %v3922_v14 = vld [vmem:[#allocation8 + $0x40] ss:$16 sps:$4 sm:$0xff]   ;;  %v3942_v23 = vld [vmem:[#allocation8 + $0xa4] ss:$16 sps:$4 sm:$0xff]   ;;  %v3943_v26 = vld [vmem:[#allocation8 + $0xa8] ss:$16 sps:$4 sm:$0xff]  }
  0x8c   :  { %513 = vmatpush1.bf16.msra.mxu0 %v3483_v59  ;;  %554 = vmatpush1.bf16.msra.mxu1 %v3485_v62  ;;  %v3490_v59 = vcombine.high %v167_v49, %v171_v50  ;;  %v3496_v62 = vcombine.high %v174_v53, %v178_v54  ;;  %v3948_v27 = vld [vmem:[#allocation8 + $0xc4] ss:$16 sps:$4 sm:$0xff]   ;;  %v3955_v34 = vld [vmem:[#allocation8 + $0xe8] ss:$16 sps:$4 sm:$0xff]   ;;  %v3988_v54 = vld [vmem:[#allocation8 + $0x1a0] ss:$16 sps:$4 sm:$0xff]  }
  0x8d   :  { %514 = vmatprep.subr.bf16.mxu0 %v3492_v63  ;;  %555 = vmatprep.subr.bf16.mxu1 %v3494_v3  ;;  %v3498_v63 = vcombine.high %v175_v57, %v179_v58  ;;  %v3912_v3 = vld [vmem:[#allocation8 + $0x4] ss:$16 sps:$4 sm:$0xff]   ;;  %v3961_v38 = vld [vmem:[#allocation8 + $0x108] ss:$16 sps:$4 sm:$0xff]   ;;  %v3993_v57 = vld [vmem:[#allocation8 + $0x1ac] ss:$16 sps:$4 sm:$0xff]  }
  0x8e   :  { %v3960_v35 = vld [vmem:[#allocation8 + $0x104] ss:$16 sps:$4 sm:$0xff]   ;;  %v3967_v41 = vld [vmem:[#allocation8 + $0x128] ss:$16 sps:$4 sm:$0xff]  }
  0x8f   :  { %v3966_v39 = vld [vmem:[#allocation8 + $0x124] ss:$16 sps:$4 sm:$0xff]   ;;  %v3973_v45 = vld [vmem:[#allocation8 + $0x148] ss:$16 sps:$4 sm:$0xff]  }
  0x90   :  { %515 = vmatpush1.bf16.msra.mxu0 %v3491_v4  ;;  %556 = vmatpush1.bf16.msra.mxu1 %v3493_v7  ;;  %v3915_v4 = vld [vmem:[#allocation8 + $0xc] ss:$16 sps:$4 sm:$0xff]   ;;  %v3918_v7 = vld [vmem:[#allocation8 + $0x24] ss:$16 sps:$4 sm:$0xff]   ;;  %v3979_v49 = vld [vmem:[#allocation8 + $0x168] ss:$16 sps:$4 sm:$0xff]  }
  0x91   :  { %582 = vmatprep.subr.bf16.mxu0 %v3440_v8  ;;  %623 = vmatprep.subr.bf16.mxu1 %v3442_v12  ;;  %v3921_v8 = vld [vmem:[#allocation8 + $0x2c] ss:$16 sps:$4 sm:$0xff]   ;;  %v3924_v12 = vld [vmem:[#allocation8 + $0x44] ss:$16 sps:$4 sm:$0xff]   ;;  %v3985_v53 = vld [vmem:[#allocation8 + $0x188] ss:$16 sps:$4 sm:$0xff]  }
  0x92   :  { %v3972_v42 = vld [vmem:[#allocation8 + $0x144] ss:$16 sps:$4 sm:$0xff]  }
  0x93   :  { %533 = vmatmul.mubr.bf16.vlgmr.msra.gmra.mrb[0].mxu0 %v4687_v11  ;;  %574 = vmatmul.mubr.bf16.vlgmr.msra.gmra.mrb[0].mxu1 %v4687_v11  ;;  %v3978_v46 = vld [vmem:[#allocation8 + $0x164] ss:$16 sps:$4 sm:$0xff]  }
  0x94   :  { %583 = vmatpush1.bf16.msra.mxu0 %v3439_v13  ;;  %624 = vmatpush1.bf16.msra.mxu1 %v3441_v16  ;;  %v3927_v13 = vld [vmem:[#allocation8 + $0x4c] ss:$16 sps:$4 sm:$0xff]   ;;  %v3984_v50 = vld [vmem:[#allocation8 + $0x184] ss:$16 sps:$4 sm:$0xff]  }
  0x95   :  { %584 = vmatprep.subr.bf16.mxu0 %v3448_v17  ;;  %625 = vmatprep.subr.bf16.mxu1 %v3450_v20  ;;  %v3933_v16 = vld [vmem:[#allocation8 + $0x6c] ss:$16 sps:$4 sm:$0xff]   ;;  %v3928_v17 = vld [vmem:[#allocation8 + $0x60] ss:$16 sps:$4 sm:$0xff]   ;;  %v3996_v58 = vld [vmem:[#allocation8 + $0x1c4] ss:$16 sps:$4 sm:$0xff]  }
  0x96   :  { %614 = vmatprep.mubr.bf16.mxu0 %v4552_v0  ;;  %655 = vmatprep.mubr.bf16.mxu1 %v4552_v0  ;;  %v3472_v0 = vcombine.high %v150_v30, %v154_v31  ;;  %v3939_v20 = vld [vmem:[#allocation8 + $0x8c] ss:$16 sps:$4 sm:$0xff]   ;;  %v3949_v30 = vld [vmem:[#allocation8 + $0xc8] ss:$16 sps:$4 sm:$0xff]   ;;  %v3954_v31 = vld [vmem:[#allocation8 + $0xe4] ss:$16 sps:$4 sm:$0xff]  }
  0x98   :  { %585 = vmatpush1.bf16.msra.mxu0 %v3447_v21  ;;  %626 = vmatpush1.bf16.msra.mxu1 %v3449_v24  ;;  %v3934_v21 = vld [vmem:[#allocation8 + $0x80] ss:$16 sps:$4 sm:$0xff]   ;;  %v3945_v24 = vld [vmem:[#allocation8 + $0xac] ss:$16 sps:$4 sm:$0xff]  }
  0x99   :  { %586 = vmatprep.subr.bf16.mxu0 %v3456_v25  ;;  %627 = vmatprep.subr.bf16.mxu1 %v3458_v28  ;;  %v3940_v25 = vld [vmem:[#allocation8 + $0xa0] ss:$16 sps:$4 sm:$0xff]   ;;  %v3951_v28 = vld [vmem:[#allocation8 + $0xcc] ss:$16 sps:$4 sm:$0xff]  }
  0x9c   :  { %587 = vmatpush1.bf16.msra.mxu0 %v3455_v29  ;;  %628 = vmatpush1.bf16.msra.mxu1 %v3457_v32  ;;  %v3946_v29 = vld [vmem:[#allocation8 + $0xc0] ss:$16 sps:$4 sm:$0xff]   ;;  %v3957_v32 = vld [vmem:[#allocation8 + $0xec] ss:$16 sps:$4 sm:$0xff]  }
  0x9d   :  { %588 = vmatprep.subr.bf16.mxu0 %v3464_v33  ;;  %629 = vmatprep.subr.bf16.mxu1 %v3466_v36  ;;  %v3952_v33 = vld [vmem:[#allocation8 + $0xe0] ss:$16 sps:$4 sm:$0xff]   ;;  %v3963_v36 = vld [vmem:[#allocation8 + $0x10c] ss:$16 sps:$4 sm:$0xff]  }
  0xa0   :  { %589 = vmatpush1.bf16.msra.mxu0 %v3463_v37  ;;  %630 = vmatpush1.bf16.msra.mxu1 %v3465_v40  ;;  %v3958_v37 = vld [vmem:[#allocation8 + $0x100] ss:$16 sps:$4 sm:$0xff]   ;;  %v3969_v40 = vld [vmem:[#allocation8 + $0x12c] ss:$16 sps:$4 sm:$0xff]  }
  0xa1   :  { %590 = vmatprep.subr.bf16.mxu0 %v3472_v0  ;;  %631 = vmatprep.subr.bf16.mxu1 %v3474_v43  ;;  %v3964_v0 = vld [vmem:[#allocation8 + $0x120] ss:$16 sps:$4 sm:$0xff]   ;;  %v3975_v43 = vld [vmem:[#allocation8 + $0x14c] ss:$16 sps:$4 sm:$0xff]  }
  0xa4   :  { %591 = vmatpush1.bf16.msra.mxu0 %v3471_v44  ;;  %632 = vmatpush1.bf16.msra.mxu1 %v3473_v47  ;;  %v3970_v44 = vld [vmem:[#allocation8 + $0x140] ss:$16 sps:$4 sm:$0xff]   ;;  %v3981_v47 = vld [vmem:[#allocation8 + $0x16c] ss:$16 sps:$4 sm:$0xff]  }
  0xa5   :  { %592 = vmatprep.subr.bf16.mxu0 %v3480_v48  ;;  %633 = vmatprep.subr.bf16.mxu1 %v3482_v51  ;;  %v3976_v48 = vld [vmem:[#allocation8 + $0x160] ss:$16 sps:$4 sm:$0xff]   ;;  %v3987_v51 = vld [vmem:[#allocation8 + $0x18c] ss:$16 sps:$4 sm:$0xff]  }
  0xa8   :  { %593 = vmatpush1.bf16.msra.mxu0 %v3479_v52  ;;  %634 = vmatpush1.bf16.msra.mxu1 %v3481_v55  ;;  %v3982_v52 = vld [vmem:[#allocation8 + $0x180] ss:$16 sps:$4 sm:$0xff]   ;;  %v3990_v55 = vld [vmem:[#allocation8 + $0x1a4] ss:$16 sps:$4 sm:$0xff]  }
  0xa9   :  { %594 = vmatprep.subr.bf16.mxu0 %v3488_v56  ;;  %635 = vmatprep.subr.bf16.mxu1 %v3490_v59  ;;  %v3991_v56 = vld [vmem:[#allocation8 + $0x1a8] ss:$16 sps:$4 sm:$0xff]   ;;  %v3999_v59 = vld [vmem:[#allocation8 + $0x1cc] ss:$16 sps:$4 sm:$0xff]  }
  0xac   :  { %595 = vmatpush1.bf16.msra.mxu0 %v3487_v60  ;;  %636 = vmatpush1.bf16.msra.mxu1 %v3489_v61  ;;  %v3994_v60 = vld [vmem:[#allocation8 + $0x1c0] ss:$16 sps:$4 sm:$0xff]   ;;  %v3997_v61 = vld [vmem:[#allocation8 + $0x1c8] ss:$16 sps:$4 sm:$0xff]  }
  0xad   :  { %596 = vmatprep.subr.bf16.mxu0 %v3496_v62  ;;  %637 = vmatprep.subr.bf16.mxu1 %v3498_v63  ;;  %v4002_v62 = vld [vmem:[#allocation8 + $0x1e4] ss:$16 sps:$4 sm:$0xff]   ;;  %v4005_v63 = vld [vmem:[#allocation8 + $0x1ec] ss:$16 sps:$4 sm:$0xff]  }
  0xb0   :  { %597 = vmatpush1.bf16.msra.mxu0 %v3495_v1  ;;  %638 = vmatpush1.bf16.msra.mxu1 %v3497_v2  ;;  %v4000_v1 = vld [vmem:[#allocation8 + $0x1e0] ss:$16 sps:$4 sm:$0xff]   ;;  %v4003_v2 = vld [vmem:[#allocation8 + $0x1e8] ss:$16 sps:$4 sm:$0xff]  }
  0xb1   :  { %2587 = vmatprep.subr.bf16.mxu0 %v3912_v3  ;;  %2751 = vmatprep.subr.bf16.mxu1 %v3915_v4  ;;  %v4008_v3 = vld [vmem:[#allocation8 + $0x204] ss:$16 sps:$4 sm:$0xff]   ;;  %v4011_v4 = vld [vmem:[#allocation8 + $0x20c] ss:$16 sps:$4 sm:$0xff]  }
  0xb3   :  { %615 = vmatmul.mubr.bf16.vlgmr.msra.gmra.mrb[4].mxu0 %v4687_v11  ;;  %656 = vmatmul.mubr.bf16.vlgmr.msra.gmra.mrb[4].mxu1 %v4687_v11  ;;  %v3925_v11 = vld [vmem:[#allocation8 + $0x48] ss:$16 sps:$4 sm:$0xff]  }
  0xb4   :  { %2588 = vmatpush1.bf16.msra.mxu0 %v3910_v5  ;;  %2752 = vmatpush1.bf16.msra.mxu1 %v3913_v6 }
  0xb5   :  { %2589 = vmatprep.subr.bf16.mxu0 %v3918_v7  ;;  %2753 = vmatprep.subr.bf16.mxu1 %v3921_v8 }
  0xb8   :  { %2590 = vmatpush1.bf16.msra.mxu0 %v3916_v9  ;;  %2754 = vmatpush1.bf16.msra.mxu1 %v3919_v10 }
  0xb9   :  { %2591 = vmatprep.subr.bf16.mxu0 %v3924_v12  ;;  %2755 = vmatprep.subr.bf16.mxu1 %v3927_v13 }
  0xbc   :  { %2592 = vmatpush1.bf16.msra.mxu0 %v3922_v14  ;;  %2756 = vmatpush1.bf16.msra.mxu1 %v3925_v11 }
  0xbd   :  { %2593 = vmatprep.subr.bf16.mxu0 %v3930_v15  ;;  %2757 = vmatprep.subr.bf16.mxu1 %v3933_v16 }
  0xc0   :  { %2594 = vmatpush1.bf16.msra.mxu0 %v3928_v17  ;;  %2758 = vmatpush1.bf16.msra.mxu1 %v3931_v18 }
  0xc1   :  { %2595 = vmatprep.subr.bf16.mxu0 %v3936_v19  ;;  %2759 = vmatprep.subr.bf16.mxu1 %v3939_v20 }
  0xc4   :  { %2596 = vmatpush1.bf16.msra.mxu0 %v3934_v21  ;;  %2760 = vmatpush1.bf16.msra.mxu1 %v3937_v22 }
  0xc5   :  { %2597 = vmatprep.subr.bf16.mxu0 %v3942_v23  ;;  %2761 = vmatprep.subr.bf16.mxu1 %v3945_v24 }
  0xc8   :  { %2598 = vmatpush1.bf16.msra.mxu0 %v3940_v25  ;;  %2762 = vmatpush1.bf16.msra.mxu1 %v3943_v26 }
  0xc9   :  { %2599 = vmatprep.subr.bf16.mxu0 %v3948_v27  ;;  %2763 = vmatprep.subr.bf16.mxu1 %v3951_v28 }
  0xcc   :  { %2600 = vmatpush1.bf16.msra.mxu0 %v3946_v29  ;;  %2764 = vmatpush1.bf16.msra.mxu1 %v3949_v30 }
  0xcd   :  { %2601 = vmatprep.subr.bf16.mxu0 %v3954_v31  ;;  %2765 = vmatprep.subr.bf16.mxu1 %v3957_v32 }
  0xd0   :  { %2602 = vmatpush1.bf16.msra.mxu0 %v3952_v33  ;;  %2766 = vmatpush1.bf16.msra.mxu1 %v3955_v34 }
  0xd1   :  { %2603 = vmatprep.subr.bf16.mxu0 %v3960_v35  ;;  %2767 = vmatprep.subr.bf16.mxu1 %v3963_v36 }
  0xd4   :  { %2604 = vmatpush1.bf16.msra.mxu0 %v3958_v37  ;;  %2768 = vmatpush1.bf16.msra.mxu1 %v3961_v38 }
  0xd5   :  { %2605 = vmatprep.subr.bf16.mxu0 %v3966_v39  ;;  %2769 = vmatprep.subr.bf16.mxu1 %v3969_v40 }
  0xd8   :  { %2606 = vmatpush1.bf16.msra.mxu0 %v3964_v0  ;;  %2770 = vmatpush1.bf16.msra.mxu1 %v3967_v41 }
  0xd9   :  { %2607 = vmatprep.subr.bf16.mxu0 %v3972_v42  ;;  %2771 = vmatprep.subr.bf16.mxu1 %v3975_v43 }
  0xdc   :  { %2608 = vmatpush1.bf16.msra.mxu0 %v3970_v44  ;;  %2772 = vmatpush1.bf16.msra.mxu1 %v3973_v45 }
  0xdd   :  { %2609 = vmatprep.subr.bf16.mxu0 %v3978_v46  ;;  %2773 = vmatprep.subr.bf16.mxu1 %v3981_v47 }
  0xe0   :  { %2610 = vmatpush1.bf16.msra.mxu0 %v3976_v48  ;;  %2774 = vmatpush1.bf16.msra.mxu1 %v3979_v49 }
  0xe1   :  { %2611 = vmatprep.subr.bf16.mxu0 %v3984_v50  ;;  %2775 = vmatprep.subr.bf16.mxu1 %v3987_v51 }
  0xe4   :  { %2612 = vmatpush1.bf16.msra.mxu0 %v3982_v52  ;;  %2776 = vmatpush1.bf16.msra.mxu1 %v3985_v53 }
  0xe5   :  { %2613 = vmatprep.subr.bf16.mxu0 %v3990_v55  ;;  %2777 = vmatprep.subr.bf16.mxu1 %v3993_v57 }
  0xe8   :  { %2614 = vmatpush1.bf16.msra.mxu0 %v3988_v54  ;;  %2778 = vmatpush1.bf16.msra.mxu1 %v3991_v56 }
  0xe9   :  { %2615 = vmatprep.subr.bf16.mxu0 %v3996_v58  ;;  %2779 = vmatprep.subr.bf16.mxu1 %v3999_v59 }
  0xec   :  { %2616 = vmatpush1.bf16.msra.mxu0 %v3994_v60  ;;  %2780 = vmatpush1.bf16.msra.mxu1 %v3997_v61 }
  0xed   :  { %2617 = vmatprep.subr.bf16.mxu0 %v4002_v62  ;;  %2781 = vmatprep.subr.bf16.mxu1 %v4005_v63 }
  0xf0   :  { %2618 = vmatpush1.bf16.msra.mxu0 %v4000_v1  ;;  %2782 = vmatpush1.bf16.msra.mxu1 %v4003_v2 }
  0xf1   :  { %2628 = vmatprep.subr.bf16.mxu0 %v4008_v3  ;;  %2792 = vmatprep.subr.bf16.mxu1 %v4011_v4 }
 0x166   :  { %v4695_v5 = vpop.f32.mrb[0].mxu0  ;;  %v4698_v7 = vpop.f32.mrb[0].mxu1 }
 0x167   :  { %v666_v6 = vrot.slane %v4695_v5, 4  ;;  %v4700_v8 = vpop.f32.mrb[1].mxu0  ;;  %v678_v9 = vrot.slane %v4698_v7, 4  ;;  %v4704_v12 = vpop.f32.mrb[1].mxu1 }
 0x168   :  { %v672_v10 = vrot.slane %v4700_v8, 4  ;;  %v538_v13 = vpop.f32.mrb[2].mxu0  ;;  %v684_v11 = vrot.slane %v4704_v12, 4  ;;  %v579_v15 = vpop.f32.mrb[2].mxu1 }
 0x169   :  { %v667_v14 = vadd.f32 %v666_v6, %v4695_v5  ;;  %v539_v16 = vpop.f32.mrb[3].mxu0  ;;  %v679_v17 = vadd.f32 %v678_v9, %v4698_v7  ;;  %v580_v19 = vpop.f32.mrb[3].mxu1 }
 0x16a   :  { %v673_v18 = vadd.f32 %v672_v10, %v4700_v8  ;;  %v685_v21 = vadd.f32 %v684_v11, %v4704_v12 }
 0x16b   :  { %v668_v20 = vrot.slane %v667_v14, 2  ;;  %v680_v22 = vrot.slane %v679_v17, 2 }
 0x16c   :  { %v674_v23 = vrot.slane %v673_v18, 2  ;;  %v686_v25 = vrot.slane %v685_v21, 2 }
 0x16d   :  { %v669_v24 = vadd.f32 %v668_v20, %v667_v14  ;;  %v681_v26 = vadd.f32 %v680_v22, %v679_v17 }
 0x16e   :  { %v675_v27 = vadd.f32 %v674_v23, %v673_v18  ;;  %v687_v29 = vadd.f32 %v686_v25, %v685_v21 }
 0x16f   :  { %v670_v28 = vrot.slane %v669_v24, 1  ;;  %v682_v30 = vrot.slane %v681_v26, 1 }
 0x170   :  { %v676_v31 = vrot.slane %v675_v27, 1  ;;  %v688_v33 = vrot.slane %v687_v29, 1 }
 0x171   :  { %v671_v32 = vadd.f32 %v670_v28, %v669_v24  ;;  %v683_v34 = vadd.f32 %v682_v30, %v681_v26 }
 0x172   :  { %v677_v35 = vadd.f32 %v676_v31, %v675_v27  ;;  %v689_v37 = vadd.f32 %v688_v33, %v687_v29 }
 0x173   :  { %v4711_v36 = vmul.f32 0.125, %v671_v32  ;;  %v4713_v38 = vmul.f32 0.125, %v683_v34 }
 0x174   :  { %v4715_v39 = vmul.f32 0.125, %v677_v35  ;;  %v4719_v0 = vmul.f32 0.125, %v689_v37  ;;  %v4553_v35 = vmov 1966171168  }
 0x175   :  { %v723_v40 = vsub.f32 %v4695_v5, %v4711_v36  ;;  %v725_v41 = vsub.f32 %v4698_v7, %v4713_v38  ;;  %v824_v37 = vunpack.c.l.s4 %v4553_v35 }
 0x176   :  { %v724_v42 = vsub.f32 %v4700_v8, %v4715_v39  ;;  %v726_v44 = vsub.f32 %v4704_v12, %v4719_v0 }
 0x177   :  { %v731_v43 = vmul.f32 %v723_v40, %v723_v40  ;;  %v733_v45 = vmul.f32 %v725_v41, %v725_v41  ;;  %v826_v40 = vlaneseq }
 0x178   :  { %v732_v46 = vmul.f32 %v724_v42, %v724_v42  ;;  %v734_v48 = vmul.f32 %v726_v44, %v726_v44 }
 0x179   :  { %v739_v47 = vrot.slane %v731_v43, 4  ;;  %v751_v49 = vrot.slane %v733_v45, 4 }
 0x17a   :  { %v745_v50 = vrot.slane %v732_v46, 4  ;;  %v757_v52 = vrot.slane %v734_v48, 4 }
 0x17b   :  { %v740_v51 = vadd.f32 %v739_v47, %v731_v43  ;;  %v752_v53 = vadd.f32 %v751_v49, %v733_v45 }
 0x17c   :  { %v746_v54 = vadd.f32 %v745_v50, %v732_v46  ;;  %v758_v56 = vadd.f32 %v757_v52, %v734_v48  ;;  %v825_v50 = vunpack.c.0.s8 %v824_v37  ;;  %v4743_v52 = vshrl.u32 %v826_v40, 7 }
 0x17d   :  { %v741_v55 = vrot.slane %v740_v51, 2  ;;  %v753_v57 = vrot.slane %v752_v53, 2 }
 0x17e   :  { %v747_v58 = vrot.slane %v746_v54, 2  ;;  %v759_v60 = vrot.slane %v758_v56, 2 }
 0x17f   :  { %v742_v59 = vadd.f32 %v741_v55, %v740_v51  ;;  %v754_v61 = vadd.f32 %v753_v57, %v752_v53 }
 0x180   :  { %v748_v62 = vadd.f32 %v747_v58, %v746_v54  ;;  %v760_v1 = vadd.f32 %v759_v60, %v758_v56 }
 0x181   :  { %v743_v63 = vrot.slane %v742_v59, 1  ;;  %v755_v2 = vrot.slane %v754_v61, 1 }
 0x182   :  { %v749_v3 = vrot.slane %v748_v62, 1  ;;  %v761_v6 = vrot.slane %v760_v1, 1 }
 0x183   :  { %v744_v4 = vadd.f32 %v743_v63, %v742_v59  ;;  %v756_v9 = vadd.f32 %v755_v2, %v754_v61  ;;  %v4748_v63 = vsub.s32 %v825_v50, %v4743_v52 }
 0x184   :  { %v750_v10 = vadd.f32 %v749_v3, %v748_v62  ;;  %v762_v14 = vadd.f32 %v761_v6, %v760_v1 }
 0x185   :  { %v787_v13 = vmul.f32 0.125, %v744_v4  ;;  %v789_v11 = vmul.f32 0.125, %v756_v9 }
 0x186   :  { %v788_v15 = vmul.f32 0.125, %v750_v10  ;;  %v4727_v16 = vpop.f32.mrb[4].mxu0  ;;  %v790_v18 = vmul.f32 0.125, %v762_v14  ;;  %v4730_v20 = vpop.f32.mrb[4].mxu1 }
 0x187   :  { %v795_v17 = vadd.f32 1e-05, %v787_v13  ;;  %v690_v19 = vrot.slane %v4727_v16, 4  ;;  %v4732_v21 = vpop.f32.mrb[5].mxu0  ;;  %v797_v22 = vadd.f32 1e-05, %v789_v11 }
 0x188   :  { %v796_v23 = vadd.f32 1e-05, %v788_v15  ;;  %v702_v24 = vrot.slane %v4730_v20, 4  ;;  %v696_v25 = vrot.slane %v4732_v21, 4  ;;  %v798_v26 = vadd.f32 1e-05, %v790_v18 }
 0x189   :  { %4334 = vrsqrt.f32 %v795_v17  ;;  %v691_v27 = vadd.f32 %v690_v19, %v4727_v16  ;;  %v4737_v28 = vpop.f32.mrb[5].mxu1  ;;  %v620_v29 = vpop.f32.mrb[6].mxu0 }
 0x18a   :  { %4336 = vrsqrt.f32 %v797_v22  ;;  %v703_v30 = vadd.f32 %v702_v24, %v4730_v20  ;;  %v697_v31 = vadd.f32 %v696_v25, %v4732_v21  ;;  %v708_v32 = vrot.slane %v4737_v28, 4  ;;  %v661_v33 = vpop.f32.mrb[6].mxu1  ;;  %v621_v34 = vpop.f32.mrb[7].mxu0 }
 0x18b   :  { %4338 = vrsqrt.f32 %v796_v23  ;;  %v692_v41 = vrot.slane %v691_v27, 2  ;;  %v662_v42 = vpop.f32.mrb[7].mxu1 }
 0x18c   :  { %4340 = vrsqrt.f32 %v798_v26  ;;  %v704_v43 = vrot.slane %v703_v30, 2  ;;  %v698_v44 = vrot.slane %v697_v31, 2  ;;  %v709_v45 = vadd.f32 %v708_v32, %v4737_v28 }
 0x18d   :  { %v693_v46 = vadd.f32 %v692_v41, %v691_v27 }
 0x18e   :  { %v705_v47 = vadd.f32 %v704_v43, %v703_v30  ;;  %v699_v48 = vadd.f32 %v698_v44, %v697_v31  ;;  %v710_v49 = vrot.slane %v709_v45, 2 }
 0x18f   :  { %v694_v51 = vrot.slane %v693_v46, 1 }
 0x190   :  { %v706_v53 = vrot.slane %v705_v47, 1  ;;  %v700_v54 = vrot.slane %v699_v48, 1  ;;  %v711_v55 = vadd.f32 %v710_v49, %v709_v45 }
 0x191   :  { %v695_v56 = vadd.f32 %v694_v51, %v693_v46 }
 0x192   :  { %v707_v57 = vadd.f32 %v706_v53, %v705_v47  ;;  %v701_v58 = vadd.f32 %v700_v54, %v699_v48  ;;  %v712_v59 = vrot.slane %v711_v55, 1 }
 0x193   :  { %v4335_v60 = vpop.eup %4334  ;;  %v4745_v61 = vmul.f32 0.125, %v695_v56 }
 0x194   :  { %v4337_v62 = vpop.eup %4336  ;;  %v4750_v1 = vmul.f32 0.125, %v707_v57  ;;  %v4752_v2 = vmul.f32 0.125, %v701_v58  ;;  %v713_v3 = vadd.f32 %v712_v59, %v711_v55 }
 0x195   :  { %v4339_v4 = vpop.eup %4338  ;;  %v727_v6 = vsub.f32 %v4727_v16, %v4745_v61 }
 0x196   :  { %v4341_v9 = vpop.eup %4340  ;;  %v819_v10 = vcombine.low %v4335_v60, %v4339_v4  ;;  %v729_v13 = vsub.f32 %v4730_v20, %v4750_v1  ;;  %v728_v14 = vsub.f32 %v4732_v21, %v4752_v2  ;;  %v4760_v11 = vmul.f32 0.125, %v713_v3 }
 0x197   :  { %v820_v15 = vcombine.low %v4337_v62, %v4341_v9  ;;  %v735_v17 = vmul.f32 %v727_v6, %v727_v6 }
 0x198   :  { %v829_v18 = vrot.slane %v819_v10, %v4748_v63  ;;  %v737_v19 = vmul.f32 %v729_v13, %v729_v13  ;;  %v736_v22 = vmul.f32 %v728_v14, %v728_v14  ;;  %v730_v23 = vsub.f32 %v4737_v28, %v4760_v11 }
 0x199   :  { %v836_v24 = vrot.slane %v820_v15, %v4748_v63  ;;  %v763_v25 = vrot.slane %v735_v17, 4 }
 0x19a   :  { %v775_v26 = vrot.slane %v737_v19, 4  ;;  %v769_v27 = vrot.slane %v736_v22, 4  ;;  %v738_v29 = vmul.f32 %v730_v23, %v730_v23 }
 0x19b   :  { %v851_v30 = vcombine.low %v829_v18, %v836_v24  ;;  %v764_v31 = vadd.f32 %v763_v25, %v735_v17  ;;  %v664_v24 = vld [vmem:[#allocation7] sm:$0xff]  ;;  %v889_v25 = vsub.s32 4, %v4743_v52 }
 0x19c   :  { %v776_v32 = vadd.f32 %v775_v26, %v737_v19  ;;  %v770_v33 = vadd.f32 %v769_v27, %v736_v22  ;;  %v781_v34 = vrot.slane %v738_v29, 4  ;;  %v893_v27 = vsub.s32 5, %v4743_v52 }
 0x19d   :  { %v765_v35 = vrot.slane %v764_v31, 2  ;;  %v859_v22 = vrot.slane %v851_v30, %v4748_v63  ;;  %v885_v30 = vsub.s32 3, %v4743_v52 }
 0x19e   :  { %v777_v37 = vrot.slane %v776_v32, 2  ;;  %v771_v40 = vrot.slane %v770_v33, 2  ;;  %v782_v41 = vadd.f32 %v781_v34, %v738_v29  ;;  %v897_v29 = vsub.s32 6, %v4743_v52 }
 0x19f   :  { %v766_v42 = vadd.f32 %v765_v35, %v764_v31  ;;  %v901_v31 = vsub.s32 7, %v4743_v52  ;;  %v881_v34 = vsub.s32 2, %v4743_v52 }
 0x1a0   :  { %v778_v43 = vadd.f32 %v777_v37, %v776_v32  ;;  %v772_v44 = vadd.f32 %v771_v40, %v770_v33  ;;  %v783_v45 = vrot.slane %v782_v41, 2  ;;  %v4775_v32 = vsub.s32 0, %v4743_v52 }
 0x1a1   :  { %v767_v46 = vrot.slane %v766_v42, 1  ;;  %v877_v33 = vsub.s32 1, %v4743_v52 }
 0x1a2   :  { %v779_v47 = vrot.slane %v778_v43, 1  ;;  %v773_v48 = vrot.slane %v772_v44, 1  ;;  %v784_v49 = vadd.f32 %v783_v45, %v782_v41 }
 0x1a3   :  { %v768_v50 = vadd.f32 %v767_v46, %v766_v42 }
 0x1a4   :  { %v780_v51 = vadd.f32 %v779_v47, %v778_v43  ;;  %v774_v53 = vadd.f32 %v773_v48, %v772_v44  ;;  %v785_v54 = vrot.slane %v784_v49, 1 }
 0x1a5   :  { %v791_v55 = vmul.f32 0.125, %v768_v50 }
 0x1a6   :  { %v793_v56 = vmul.f32 0.125, %v780_v51  ;;  %v792_v57 = vmul.f32 0.125, %v774_v53  ;;  %v786_v58 = vadd.f32 %v785_v54, %v784_v49 }
 0x1a7   :  { %v799_v59 = vadd.f32 1e-05, %v791_v55 }
 0x1a8   :  { %v801_v60 = vadd.f32 1e-05, %v793_v56  ;;  %v800_v62 = vadd.f32 1e-05, %v792_v57  ;;  %v794_v3 = vmul.f32 0.125, %v786_v58 }
 0x1a9   :  { %4342 = vrsqrt.f32 %v799_v59 }
 0x1aa   :  { %4344 = vrsqrt.f32 %v801_v60  ;;  %v802_v4 = vadd.f32 1e-05, %v794_v3  ;;  %v665_v3 = vld [vmem:[%s4857_s3] sm:$0xff] }
 0x1ab   :  { %4346 = vrsqrt.f32 %v800_v62 }
 0x1ac   :  { %4348 = vrsqrt.f32 %v802_v4 }
 0x1b3   :  { %v4343_v6 = vpop.eup %4342 }
 0x1b4   :  { %v4345_v9 = vpop.eup %4344 }
 0x1b5   :  { %v4347_v10 = vpop.eup %4346 }
 0x1b6   :  { %v4349_v13 = vpop.eup %4348  ;;  %v821_v14 = vcombine.low %v4343_v6, %v4347_v10 }
 0x1b7   :  { %v822_v15 = vcombine.low %v4345_v9, %v4349_v13 }
 0x1b8   :  { %v843_v17 = vrot.slane %v821_v14, %v4748_v63 }
 0x1b9   :  { %v850_v18 = vrot.slane %v822_v15, %v4748_v63 }
 0x1bb   :  { %v852_v19 = vcombine.low %v843_v17, %v850_v18 }
 0x1bd   :  { %v866_v23 = vrot.slane %v852_v19, %v4748_v63 }
 0x1bf   :  { %v867_v26 = vcombine.low %v859_v22, %v866_v23 }
 0x1c1   :  { %v869_v35 = vmul.f32 %v867_v26, %v664_v24 }
 0x1c3   :  { %v890_v37 = vrot.slane %v869_v35, %v889_v25  ;;  %v894_v40 = vrot.slane %v869_v35, %v893_v27  ;;  %v898_v41 = vrot.slane %v869_v35, %v897_v29  ;;  %v902_v42 = vrot.slane %v869_v35, %v901_v31 }
 0x1c4   :  { %v874_v43 = vrot.slane %v869_v35, %v4775_v32  ;;  %v878_v44 = vrot.slane %v869_v35, %v877_v33  ;;  %v882_v45 = vrot.slane %v869_v35, %v881_v34  ;;  %v886_v46 = vrot.slane %v869_v35, %v885_v30  ;;  %v4014_v35 = vld [vmem:[#allocation8 + $0x224] ss:$16 sps:$4 sm:$0xff]  }
 0x1c5   :  { %v915_v47 = vmul.f32 %v890_v37, %v4745_v61  ;;  %v916_v48 = vmul.f32 %v894_v40, %v4752_v2  ;;  %v917_v49 = vmul.f32 %v898_v41, %v4750_v1  ;;  %v918_v50 = vmul.f32 %v902_v42, %v4760_v11 }
 0x1c6   :  { %v985_v52 = vmul.f32 %v902_v42, %v4737_v28  ;;  %v911_v51 = vmul.f32 %v874_v43, %v4711_v36  ;;  %v912_v53 = vmul.f32 %v878_v44, %v4715_v39  ;;  %v913_v54 = vmul.f32 %v882_v45, %v4713_v38  ;;  %v4015_v42 = vld [vmem:[#allocation8 + $0x228] ss:$16 sps:$4 sm:$0xff]  }
 0x1c7   :  { %v929_v55 = vcombine.low %v915_v47, %v916_v48  ;;  %v930_v56 = vcombine.low %v917_v49, %v918_v50  ;;  %v914_v57 = vmul.f32 %v886_v46, %v4719_v0  ;;  %v979_v61 = vmul.f32 %v878_v44, %v4700_v8  ;;  %v4023_v44 = vld [vmem:[#allocation8 + $0x24c] ss:$16 sps:$4 sm:$0xff]   ;;  %v4026_v47 = vld [vmem:[#allocation8 + $0x264] ss:$16 sps:$4 sm:$0xff]   ;;  %v4024_v49 = vld [vmem:[#allocation8 + $0x260] ss:$16 sps:$4 sm:$0xff]  }
 0x1c8   :  { %v927_v58 = vcombine.low %v911_v51, %v912_v53  ;;  %v978_v2 = vmul.f32 %v874_v43, %v4695_v5  ;;  %v981_v1 = vmul.f32 %v886_v46, %v4704_v12  ;;  %v980_v11 = vmul.f32 %v882_v45, %v4698_v7  ;;  %v4020_v43 = vld [vmem:[#allocation8 + $0x244] ss:$16 sps:$4 sm:$0xff]   ;;  %v4018_v45 = vld [vmem:[#allocation8 + $0x240] ss:$16 sps:$4 sm:$0xff]   ;;  %v4021_v46 = vld [vmem:[#allocation8 + $0x248] ss:$16 sps:$4 sm:$0xff]  }
 0x1c9   :  { %v951_v28 = vrot.slane %v929_v55, %v4748_v63  ;;  %v958_v36 = vrot.slane %v930_v56, %v4748_v63  ;;  %v928_v39 = vcombine.low %v913_v54, %v914_v57  ;;  %v983_v38 = vmul.f32 %v894_v40, %v4732_v21  ;;  %v4029_v48 = vld [vmem:[#allocation8 + $0x26c] ss:$16 sps:$4 sm:$0xff]   ;;  %v4027_v50 = vld [vmem:[#allocation8 + $0x268] ss:$16 sps:$4 sm:$0xff]   ;;  %v4030_v53 = vld [vmem:[#allocation8 + $0x280] ss:$16 sps:$4 sm:$0xff]  }
 0x1ca   :  { %v937_v59 = vrot.slane %v927_v58, %v4748_v63  ;;  %v982_v0 = vmul.f32 %v890_v37, %v4727_v16  ;;  %v984_v8 = vmul.f32 %v898_v41, %v4730_v20  ;;  %v4017_v37 = vld [vmem:[#allocation8 + $0x22c] ss:$16 sps:$4 sm:$0xff]   ;;  %v4012_v41 = vld [vmem:[#allocation8 + $0x220] ss:$16 sps:$4 sm:$0xff]   ;;  %v4033_v54 = vld [vmem:[#allocation8 + $0x288] ss:$16 sps:$4 sm:$0xff]  }
 0x1cb   :  { %v960_v60 = vcombine.low %v951_v28, %v958_v36  ;;  %v944_v5 = vrot.slane %v928_v39, %v4748_v63  ;;  %v4035_v51 = vld [vmem:[#allocation8 + $0x28c] ss:$16 sps:$4 sm:$0xff]   ;;  %v4038_v55 = vld [vmem:[#allocation8 + $0x2a4] ss:$16 sps:$4 sm:$0xff]   ;;  %v4036_v57 = vld [vmem:[#allocation8 + $0x2a0] ss:$16 sps:$4 sm:$0xff]  }
 0x1cc   :  { %v4041_v56 = vld [vmem:[#allocation8 + $0x2ac] ss:$16 sps:$4 sm:$0xff]   ;;  %v4044_v58 = vld [vmem:[#allocation8 + $0x2c4] ss:$16 sps:$4 sm:$0xff]   ;;  %v4048_v39 = vld [vmem:[#allocation8 + $0x2e0] ss:$16 sps:$4 sm:$0xff]  }
 0x1cd   :  { %v974_v12 = vrot.slane %v960_v60, %v4748_v63  ;;  %v959_v62 = vcombine.low %v937_v59, %v944_v5  ;;  %v4050_v28 = vld [vmem:[#allocation8 + $0x2e4] ss:$16 sps:$4 sm:$0xff]   ;;  %v4053_v36 = vld [vmem:[#allocation8 + $0x2ec] ss:$16 sps:$4 sm:$0xff]   ;;  %v4057_v60 = vld [vmem:[#allocation8 + $0x308] ss:$16 sps:$4 sm:$0xff]  }
 0x1ce   :  { %v4056_v59 = vld [vmem:[#allocation8 + $0x304] ss:$16 sps:$4 sm:$0xff]  }
 0x1cf   :  { %v967_v7 = vrot.slane %v959_v62, %v4748_v63  ;;  %v4062_v5 = vld [vmem:[#allocation8 + $0x324] ss:$16 sps:$4 sm:$0xff]   ;;  %v4060_v62 = vld [vmem:[#allocation8 + $0x320] ss:$16 sps:$4 sm:$0xff]  }
 0x1d1   :  { %v975_v4 = vcombine.low %v967_v7, %v974_v12  ;;  %v4065_v12 = vld [vmem:[#allocation8 + $0x32c] ss:$16 sps:$4 sm:$0xff]   ;;  %v4063_v7 = vld [vmem:[#allocation8 + $0x328] ss:$16 sps:$4 sm:$0xff]  }
 0x1d3   :  { %v977_v21 = vsub.f32 %v665_v3, %v975_v4  ;;  %v4068_v3 = vld [vmem:[#allocation8 + $0x344] ss:$16 sps:$4 sm:$0xff]   ;;  %v4071_v4 = vld [vmem:[#allocation8 + $0x34c] ss:$16 sps:$4 sm:$0xff]  }
 0x1d5   :  { %v994_v6 = vrot.slane %v977_v21, %v877_v33  ;;  %v990_v9 = vrot.slane %v977_v21, %v4775_v32  ;;  %v1002_v16 = vrot.slane %v977_v21, %v885_v30  ;;  %v998_v10 = vrot.slane %v977_v21, %v881_v34 }
 0x1d6   :  { %v1010_v20 = vrot.slane %v977_v21, %v893_v27  ;;  %v1006_v13 = vrot.slane %v977_v21, %v889_v25  ;;  %v1018_v14 = vrot.slane %v977_v21, %v901_v31  ;;  %v1014_v15 = vrot.slane %v977_v21, %v897_v29  ;;  %v4006_v25 = vld [vmem:[#allocation8 + $0x200] ss:$16 sps:$4 sm:$0xff]   ;;  %v4009_v31 = vld [vmem:[#allocation8 + $0x208] ss:$16 sps:$4 sm:$0xff]  }
 0x1d7   :  { %v1028_v17 = vadd.f32 %v994_v6, %v979_v61  ;;  %v1027_v18 = vadd.f32 %v990_v9, %v978_v2  ;;  %v1030_v19 = vadd.f32 %v1002_v16, %v981_v1  ;;  %v4807_v22 = vadd.f32 %v998_v10, %v980_v11  ;;  %v4039_v61 = vld [vmem:[#allocation8 + $0x2a8] ss:$16 sps:$4 sm:$0xff]   ;;  %v4047_v2 = vld [vmem:[#allocation8 + $0x2cc] ss:$16 sps:$4 sm:$0xff]   ;;  %v4042_v1 = vld [vmem:[#allocation8 + $0x2c0] ss:$16 sps:$4 sm:$0xff]  }
 0x1d8   :  { %v4809_v63 = vadd.f32 %v1010_v20, %v983_v38  ;;  %v4811_v23 = vadd.f32 %v1006_v13, %v982_v0  ;;  %v4813_v24 = vadd.f32 %v1018_v14, %v985_v52  ;;  %v4815_v26 = vadd.f32 %v1014_v15, %v984_v8  ;;  %v4032_v52 = vld [vmem:[#allocation8 + $0x284] ss:$16 sps:$4 sm:$0xff]   ;;  %v4045_v11 = vld [vmem:[#allocation8 + $0x2c8] ss:$16 sps:$4 sm:$0xff]   ;;  %v4059_v0 = vld [vmem:[#allocation8 + $0x30c] ss:$16 sps:$4 sm:$0xff]  }
 0x1d9   :  { %v1036_v33 = vmax.f32 %v1028_v17, 0.0  ;;  %v1035_v30 = vmax.f32 %v1027_v18, 0.0  ;;  %v1038_v34 = vmax.f32 %v1030_v19, 0.0  ;;  %v4051_v38 = vld [vmem:[#allocation8 + $0x2e8] ss:$16 sps:$4 sm:$0xff]  }
 0x1da   :  { %v4054_v8 = vld [vmem:[#allocation8 + $0x300] ss:$16 sps:$4 sm:$0xff]   ;;  %v4069_v6 = vld [vmem:[#allocation8 + $0x348] ss:$16 sps:$4 sm:$0xff]   ;;  %v4074_v9 = vld [vmem:[#allocation8 + $0x364] ss:$16 sps:$4 sm:$0xff]  }
 0x1db   :  { %v1044_v27 = vpack.c.bf16 %v1036_v33, %v1036_v33  ;;  %v1043_v29 = vpack.c.bf16 %v1035_v30, %v1035_v30  ;;  %v1046_v40 = vpack.c.bf16 %v1038_v34, %v1038_v34  ;;  %v4066_v21 = vld [vmem:[#allocation8 + $0x340] ss:$16 sps:$4 sm:$0xff]   ;;  %v4077_v16 = vld [vmem:[#allocation8 + $0x36c] ss:$16 sps:$4 sm:$0xff]   ;;  %v4075_v20 = vld [vmem:[#allocation8 + $0x368] ss:$16 sps:$4 sm:$0xff]  }
 0x1dc   :  { %v4072_v10 = vld [vmem:[#allocation8 + $0x360] ss:$16 sps:$4 sm:$0xff]   ;;  %v4080_v13 = vld [vmem:[#allocation8 + $0x384] ss:$16 sps:$4 sm:$0xff]   ;;  %v4083_v14 = vld [vmem:[#allocation8 + $0x38c] ss:$16 sps:$4 sm:$0xff]  }
 0x1dd   :  { %2619 = vmatprep.mubr.bf16.mxu0 %v1044_v27  ;;  %2783 = vmatprep.mubr.bf16.mxu1 %v1044_v27  ;;  %v4078_v15 = vld [vmem:[#allocation8 + $0x380] ss:$16 sps:$4 sm:$0xff]   ;;  %v4081_v17 = vld [vmem:[#allocation8 + $0x388] ss:$16 sps:$4 sm:$0xff]   ;;  %v4086_v18 = vld [vmem:[#allocation8 + $0x3a4] ss:$16 sps:$4 sm:$0xff]  }
 0x1de   :  { %2620 = vmatmul.mubr.bf16.vlgmr.msra.gmra.mrb[8].mxu0 %v1043_v29  ;;  %2784 = vmatmul.mubr.bf16.vlgmr.msra.gmra.mrb[8].mxu1 %v1043_v29  ;;  %v4089_v19 = vld [vmem:[#allocation8 + $0x3ac] ss:$16 sps:$4 sm:$0xff]   ;;  %v4084_v33 = vld [vmem:[#allocation8 + $0x3a0] ss:$16 sps:$4 sm:$0xff]   ;;  %v4087_v30 = vld [vmem:[#allocation8 + $0x3a8] ss:$16 sps:$4 sm:$0xff]  }
 0x1df   :  { %2629 = vmatpush1.bf16.msra.mxu0 %v4006_v25  ;;  %2793 = vmatpush1.bf16.msra.mxu1 %v4009_v31  ;;  %v4092_v34 = vld [vmem:[#allocation8 + $0x3c4] ss:$16 sps:$4 sm:$0xff]   ;;  %v4095_v27 = vld [vmem:[#allocation8 + $0x3cc] ss:$16 sps:$4 sm:$0xff]   ;;  %v4090_v25 = vld [vmem:[#allocation8 + $0x3c0] ss:$16 sps:$4 sm:$0xff]  }
 0x1e0   :  { %2660 = vmatprep.mubr.bf16.mxu0 %v1046_v40  ;;  %2824 = vmatprep.mubr.bf16.mxu1 %v1046_v40  ;;  %v4093_v31 = vld [vmem:[#allocation8 + $0x3c8] ss:$16 sps:$4 sm:$0xff]   ;;  %v4098_v29 = vld [vmem:[#allocation8 + $0x3e4] ss:$16 sps:$4 sm:$0xff]  }
 0x1e1   :  { %2630 = vmatprep.subr.bf16.mxu0 %v4014_v35  ;;  %2794 = vmatprep.subr.bf16.mxu1 %v4017_v37  ;;  %v4101_v35 = vld [vmem:[#allocation8 + $0x3ec] ss:$16 sps:$4 sm:$0xff]   ;;  %v4096_v37 = vld [vmem:[#allocation8 + $0x3e0] ss:$16 sps:$4 sm:$0xff]   ;;  %v4099_v40 = vld [vmem:[#allocation8 + $0x3e8] ss:$16 sps:$4 sm:$0xff]  }
 0x1e3   :  { %2631 = vmatpush1.bf16.msra.mxu0 %v4012_v41  ;;  %2795 = vmatpush1.bf16.msra.mxu1 %v4015_v42  ;;  %v1037_v41 = vmax.f32 %v4807_v22, 0.0  ;;  %v4104_v42 = vld [vmem:[#allocation8 + $0x404] ss:$16 sps:$4 sm:$0xff]   ;;  %v4111_v22 = vld [vmem:[#allocation8 + $0x428] ss:$16 sps:$4 sm:$0xff]  }
 0x1e4   :  { %2632 = vmatprep.subr.bf16.mxu0 %v4020_v43  ;;  %2796 = vmatprep.subr.bf16.mxu1 %v4023_v44  ;;  %v4107_v43 = vld [vmem:[#allocation8 + $0x40c] ss:$16 sps:$4 sm:$0xff]   ;;  %v1040_v44 = vmax.f32 %v4809_v63, 0.0 }
 0x1e5   :  { %v4119_v63 = vld [vmem:[#allocation8 + $0x44c] ss:$16 sps:$4 sm:$0xff]  }
 0x1e7   :  { %2633 = vmatpush1.bf16.msra.mxu0 %v4018_v45  ;;  %2797 = vmatpush1.bf16.msra.mxu1 %v4021_v46  ;;  %v4102_v45 = vld [vmem:[#allocation8 + $0x400] ss:$16 sps:$4 sm:$0xff]   ;;  %v1045_v46 = vpack.c.bf16 %v1037_v41, %v1037_v41  ;;  %v4188_v41 = vld [vmem:[#allocation8 + $0x5c4] ss:$16 sps:$4 sm:$0xff]  }
 0x1e8   :  { %2634 = vmatprep.subr.bf16.mxu0 %v4026_v47  ;;  %2798 = vmatprep.subr.bf16.mxu1 %v4029_v48  ;;  %v4105_v47 = vld [vmem:[#allocation8 + $0x408] ss:$16 sps:$4 sm:$0xff]   ;;  %v1048_v48 = vpack.c.bf16 %v1040_v44, %v1040_v44 }
 0x1e9   :  { %v4189_v44 = vld [vmem:[#allocation8 + $0x5c8] ss:$16 sps:$4 sm:$0xff]  }
 0x1eb   :  { %2635 = vmatpush1.bf16.msra.mxu0 %v4024_v49  ;;  %2799 = vmatpush1.bf16.msra.mxu1 %v4027_v50  ;;  %v4110_v49 = vld [vmem:[#allocation8 + $0x424] ss:$16 sps:$4 sm:$0xff]   ;;  %v4113_v50 = vld [vmem:[#allocation8 + $0x42c] ss:$16 sps:$4 sm:$0xff]  }
 0x1ec   :  { %2636 = vmatprep.subr.bf16.mxu0 %v4032_v52  ;;  %2800 = vmatprep.subr.bf16.mxu1 %v4035_v51  ;;  %v4108_v52 = vld [vmem:[#allocation8 + $0x420] ss:$16 sps:$4 sm:$0xff]   ;;  %v4116_v51 = vld [vmem:[#allocation8 + $0x444] ss:$16 sps:$4 sm:$0xff]  }
 0x1ef   :  { %2637 = vmatpush1.bf16.msra.mxu0 %v4030_v53  ;;  %2801 = vmatpush1.bf16.msra.mxu1 %v4033_v54  ;;  %v4114_v53 = vld [vmem:[#allocation8 + $0x440] ss:$16 sps:$4 sm:$0xff]   ;;  %v4117_v54 = vld [vmem:[#allocation8 + $0x448] ss:$16 sps:$4 sm:$0xff]  }
 0x1f0   :  { %2638 = vmatprep.subr.bf16.mxu0 %v4038_v55  ;;  %2802 = vmatprep.subr.bf16.mxu1 %v4041_v56  ;;  %v4122_v55 = vld [vmem:[#allocation8 + $0x464] ss:$16 sps:$4 sm:$0xff]   ;;  %v4125_v56 = vld [vmem:[#allocation8 + $0x46c] ss:$16 sps:$4 sm:$0xff]  }
 0x1f3   :  { %2639 = vmatpush1.bf16.msra.mxu0 %v4036_v57  ;;  %2803 = vmatpush1.bf16.msra.mxu1 %v4039_v61  ;;  %v4120_v57 = vld [vmem:[#allocation8 + $0x460] ss:$16 sps:$4 sm:$0xff]   ;;  %v4123_v61 = vld [vmem:[#allocation8 + $0x468] ss:$16 sps:$4 sm:$0xff]  }
 0x1f4   :  { %2640 = vmatprep.subr.bf16.mxu0 %v4044_v58  ;;  %2804 = vmatprep.subr.bf16.mxu1 %v4047_v2  ;;  %v4128_v58 = vld [vmem:[#allocation8 + $0x484] ss:$16 sps:$4 sm:$0xff]   ;;  %v4131_v2 = vld [vmem:[#allocation8 + $0x48c] ss:$16 sps:$4 sm:$0xff]  }
 0x1f7   :  { %2641 = vmatpush1.bf16.msra.mxu0 %v4042_v1  ;;  %2805 = vmatpush1.bf16.msra.mxu1 %v4045_v11  ;;  %v4126_v1 = vld [vmem:[#allocation8 + $0x480] ss:$16 sps:$4 sm:$0xff]   ;;  %v4129_v11 = vld [vmem:[#allocation8 + $0x488] ss:$16 sps:$4 sm:$0xff]  }
 0x1f8   :  { %2642 = vmatprep.subr.bf16.mxu0 %v4050_v28  ;;  %2806 = vmatprep.subr.bf16.mxu1 %v4053_v36  ;;  %v4134_v28 = vld [vmem:[#allocation8 + $0x4a4] ss:$16 sps:$4 sm:$0xff]   ;;  %v4137_v36 = vld [vmem:[#allocation8 + $0x4ac] ss:$16 sps:$4 sm:$0xff]  }
 0x1fb   :  { %2643 = vmatpush1.bf16.msra.mxu0 %v4048_v39  ;;  %2807 = vmatpush1.bf16.msra.mxu1 %v4051_v38  ;;  %v4132_v39 = vld [vmem:[#allocation8 + $0x4a0] ss:$16 sps:$4 sm:$0xff]   ;;  %v4135_v38 = vld [vmem:[#allocation8 + $0x4a8] ss:$16 sps:$4 sm:$0xff]  }
 0x1fc   :  { %2644 = vmatprep.subr.bf16.mxu0 %v4056_v59  ;;  %2808 = vmatprep.subr.bf16.mxu1 %v4059_v0  ;;  %v4140_v59 = vld [vmem:[#allocation8 + $0x4c4] ss:$16 sps:$4 sm:$0xff]   ;;  %v4143_v0 = vld [vmem:[#allocation8 + $0x4cc] ss:$16 sps:$4 sm:$0xff]  }
 0x1ff   :  { %2645 = vmatpush1.bf16.msra.mxu0 %v4054_v8  ;;  %2809 = vmatpush1.bf16.msra.mxu1 %v4057_v60  ;;  %v4138_v8 = vld [vmem:[#allocation8 + $0x4c0] ss:$16 sps:$4 sm:$0xff]   ;;  %v4141_v60 = vld [vmem:[#allocation8 + $0x4c8] ss:$16 sps:$4 sm:$0xff]  }
 0x200   :  { %2646 = vmatprep.subr.bf16.mxu0 %v4062_v5  ;;  %2810 = vmatprep.subr.bf16.mxu1 %v4065_v12  ;;  %v4146_v5 = vld [vmem:[#allocation8 + $0x4e4] ss:$16 sps:$4 sm:$0xff]   ;;  %v4149_v12 = vld [vmem:[#allocation8 + $0x4ec] ss:$16 sps:$4 sm:$0xff]  }
 0x203   :  { %2647 = vmatpush1.bf16.msra.mxu0 %v4060_v62  ;;  %2811 = vmatpush1.bf16.msra.mxu1 %v4063_v7  ;;  %v4144_v62 = vld [vmem:[#allocation8 + $0x4e0] ss:$16 sps:$4 sm:$0xff]   ;;  %v4147_v7 = vld [vmem:[#allocation8 + $0x4e8] ss:$16 sps:$4 sm:$0xff]  }
 0x204   :  { %2648 = vmatprep.subr.bf16.mxu0 %v4068_v3  ;;  %2812 = vmatprep.subr.bf16.mxu1 %v4071_v4  ;;  %v4152_v3 = vld [vmem:[#allocation8 + $0x504] ss:$16 sps:$4 sm:$0xff]   ;;  %v4155_v4 = vld [vmem:[#allocation8 + $0x50c] ss:$16 sps:$4 sm:$0xff]  }
 0x207   :  { %2649 = vmatpush1.bf16.msra.mxu0 %v4066_v21  ;;  %2813 = vmatpush1.bf16.msra.mxu1 %v4069_v6  ;;  %v4150_v21 = vld [vmem:[#allocation8 + $0x500] ss:$16 sps:$4 sm:$0xff]   ;;  %v4153_v6 = vld [vmem:[#allocation8 + $0x508] ss:$16 sps:$4 sm:$0xff]  }
 0x208   :  { %2650 = vmatprep.subr.bf16.mxu0 %v4074_v9  ;;  %2814 = vmatprep.subr.bf16.mxu1 %v4077_v16  ;;  %v4158_v9 = vld [vmem:[#allocation8 + $0x524] ss:$16 sps:$4 sm:$0xff]   ;;  %v4161_v16 = vld [vmem:[#allocation8 + $0x52c] ss:$16 sps:$4 sm:$0xff]  }
 0x20b   :  { %2651 = vmatpush1.bf16.msra.mxu0 %v4072_v10  ;;  %2815 = vmatpush1.bf16.msra.mxu1 %v4075_v20  ;;  %v4156_v10 = vld [vmem:[#allocation8 + $0x520] ss:$16 sps:$4 sm:$0xff]   ;;  %v4159_v20 = vld [vmem:[#allocation8 + $0x528] ss:$16 sps:$4 sm:$0xff]  }
 0x20c   :  { %2652 = vmatprep.subr.bf16.mxu0 %v4080_v13  ;;  %2816 = vmatprep.subr.bf16.mxu1 %v4083_v14  ;;  %v4164_v13 = vld [vmem:[#allocation8 + $0x544] ss:$16 sps:$4 sm:$0xff]   ;;  %v4167_v14 = vld [vmem:[#allocation8 + $0x54c] ss:$16 sps:$4 sm:$0xff]  }
 0x20f   :  { %2653 = vmatpush1.bf16.msra.mxu0 %v4078_v15  ;;  %2817 = vmatpush1.bf16.msra.mxu1 %v4081_v17  ;;  %v4162_v15 = vld [vmem:[#allocation8 + $0x540] ss:$16 sps:$4 sm:$0xff]   ;;  %v4165_v17 = vld [vmem:[#allocation8 + $0x548] ss:$16 sps:$4 sm:$0xff]  }
 0x210   :  { %2654 = vmatprep.subr.bf16.mxu0 %v4086_v18  ;;  %2818 = vmatprep.subr.bf16.mxu1 %v4089_v19  ;;  %v4170_v18 = vld [vmem:[#allocation8 + $0x564] ss:$16 sps:$4 sm:$0xff]   ;;  %v4173_v19 = vld [vmem:[#allocation8 + $0x56c] ss:$16 sps:$4 sm:$0xff]  }
 0x213   :  { %2655 = vmatpush1.bf16.msra.mxu0 %v4084_v33  ;;  %2819 = vmatpush1.bf16.msra.mxu1 %v4087_v30  ;;  %v4168_v33 = vld [vmem:[#allocation8 + $0x560] ss:$16 sps:$4 sm:$0xff]   ;;  %v4171_v30 = vld [vmem:[#allocation8 + $0x568] ss:$16 sps:$4 sm:$0xff]  }
 0x214   :  { %2656 = vmatprep.subr.bf16.mxu0 %v4092_v34  ;;  %2820 = vmatprep.subr.bf16.mxu1 %v4095_v27  ;;  %v4176_v34 = vld [vmem:[#allocation8 + $0x584] ss:$16 sps:$4 sm:$0xff]   ;;  %v4179_v27 = vld [vmem:[#allocation8 + $0x58c] ss:$16 sps:$4 sm:$0xff]  }
 0x217   :  { %2657 = vmatpush1.bf16.msra.mxu0 %v4090_v25  ;;  %2821 = vmatpush1.bf16.msra.mxu1 %v4093_v31  ;;  %v4174_v25 = vld [vmem:[#allocation8 + $0x580] ss:$16 sps:$4 sm:$0xff]   ;;  %v4177_v31 = vld [vmem:[#allocation8 + $0x588] ss:$16 sps:$4 sm:$0xff]  }
 0x218   :  { %2658 = vmatprep.subr.bf16.mxu0 %v4098_v29  ;;  %2822 = vmatprep.subr.bf16.mxu1 %v4101_v35  ;;  %v4182_v29 = vld [vmem:[#allocation8 + $0x5a4] ss:$16 sps:$4 sm:$0xff]   ;;  %v4185_v35 = vld [vmem:[#allocation8 + $0x5ac] ss:$16 sps:$4 sm:$0xff]  }
 0x21b   :  { %2659 = vmatpush1.bf16.msra.mxu0 %v4096_v37  ;;  %2823 = vmatpush1.bf16.msra.mxu1 %v4099_v40  ;;  %v4180_v37 = vld [vmem:[#allocation8 + $0x5a0] ss:$16 sps:$4 sm:$0xff]   ;;  %v4183_v40 = vld [vmem:[#allocation8 + $0x5a8] ss:$16 sps:$4 sm:$0xff]  }
 0x21c   :  { %2669 = vmatprep.subr.bf16.mxu0 %v4104_v42  ;;  %2833 = vmatprep.subr.bf16.mxu1 %v4107_v43  ;;  %v4191_v42 = vld [vmem:[#allocation8 + $0x5cc] ss:$16 sps:$4 sm:$0xff]   ;;  %v4186_v43 = vld [vmem:[#allocation8 + $0x5c0] ss:$16 sps:$4 sm:$0xff]  }
 0x21e   :  { %2661 = vmatmul.mubr.bf16.vlgmr.msra.gmra.mrb[8].mxu0 %v1045_v46  ;;  %2825 = vmatmul.mubr.bf16.vlgmr.msra.gmra.mrb[8].mxu1 %v1045_v46  ;;  %v4197_v46 = vld [vmem:[#allocation8 + $0x5ec] ss:$16 sps:$4 sm:$0xff]  }
 0x21f   :  { %2670 = vmatpush1.bf16.msra.mxu0 %v4102_v45  ;;  %2701 = vmatprep.mubr.bf16.mxu0 %v1048_v48  ;;  %v4194_v45 = vld [vmem:[#allocation8 + $0x5e4] ss:$16 sps:$4 sm:$0xff]  }
 0x220   :  { %2834 = vmatpush1.bf16.msra.mxu1 %v4105_v47  ;;  %2865 = vmatprep.mubr.bf16.mxu1 %v1048_v48  ;;  %v4192_v47 = vld [vmem:[#allocation8 + $0x5e0] ss:$16 sps:$4 sm:$0xff]   ;;  %v4195_v48 = vld [vmem:[#allocation8 + $0x5e8] ss:$16 sps:$4 sm:$0xff]  }
 0x221   :  { %2671 = vmatprep.subr.bf16.mxu0 %v4110_v49  ;;  %2835 = vmatprep.subr.bf16.mxu1 %v4113_v50  ;;  %v1039_v49 = vmax.f32 %v4811_v23, 0.0  ;;  %v4200_v50 = vld [vmem:[#allocation8 + $0x604] ss:$16 sps:$4 sm:$0xff]   ;;  %v4207_v23 = vld [vmem:[#allocation8 + $0x628] ss:$16 sps:$4 sm:$0xff]  }
 0x223   :  { %2672 = vmatpush1.bf16.msra.mxu0 %v4108_v52  ;;  %v4203_v52 = vld [vmem:[#allocation8 + $0x60c] ss:$16 sps:$4 sm:$0xff]  }
 0x224   :  { %2836 = vmatpush1.bf16.msra.mxu1 %v4111_v22  ;;  %2673 = vmatprep.subr.bf16.mxu0 %v4116_v51  ;;  %v1042_v22 = vmax.f32 %v4813_v24, 0.0  ;;  %v4198_v51 = vld [vmem:[#allocation8 + $0x600] ss:$16 sps:$4 sm:$0xff]   ;;  %v4215_v24 = vld [vmem:[#allocation8 + $0x64c] ss:$16 sps:$4 sm:$0xff]  }
 0x225   :  { %2837 = vmatprep.subr.bf16.mxu1 %v4119_v63  ;;  %v1047_v63 = vpack.c.bf16 %v1039_v49, %v1039_v49  ;;  %v4282_v49 = vld [vmem:[#allocation8 + $0x7c0] ss:$16 sps:$4 sm:$0xff]  }
 0x227   :  { %2674 = vmatpush1.bf16.msra.mxu0 %v4114_v53  ;;  %v4201_v53 = vld [vmem:[#allocation8 + $0x608] ss:$16 sps:$4 sm:$0xff]  }
 0x228   :  { %2838 = vmatpush1.bf16.msra.mxu1 %v4117_v54  ;;  %2675 = vmatprep.subr.bf16.mxu0 %v4122_v55  ;;  %v4206_v54 = vld [vmem:[#allocation8 + $0x624] ss:$16 sps:$4 sm:$0xff]   ;;  %v1050_v55 = vpack.c.bf16 %v1042_v22, %v1042_v22  ;;  %v4293_v22 = vld [vmem:[#allocation8 + $0x7ec] ss:$16 sps:$4 sm:$0xff]  }
 0x229   :  { %2839 = vmatprep.subr.bf16.mxu1 %v4125_v56  ;;  %v4209_v56 = vld [vmem:[#allocation8 + $0x62c] ss:$16 sps:$4 sm:$0xff]  }
 0x22b   :  { %2676 = vmatpush1.bf16.msra.mxu0 %v4120_v57  ;;  %v4204_v57 = vld [vmem:[#allocation8 + $0x620] ss:$16 sps:$4 sm:$0xff]  }
 0x22c   :  { %2840 = vmatpush1.bf16.msra.mxu1 %v4123_v61  ;;  %2677 = vmatprep.subr.bf16.mxu0 %v4128_v58  ;;  %v4212_v61 = vld [vmem:[#allocation8 + $0x644] ss:$16 sps:$4 sm:$0xff]   ;;  %v4210_v58 = vld [vmem:[#allocation8 + $0x640] ss:$16 sps:$4 sm:$0xff]  }
 0x22d   :  { %2841 = vmatprep.subr.bf16.mxu1 %v4131_v2  ;;  %v4213_v2 = vld [vmem:[#allocation8 + $0x648] ss:$16 sps:$4 sm:$0xff]  }
 0x22f   :  { %2678 = vmatpush1.bf16.msra.mxu0 %v4126_v1  ;;  %v4218_v1 = vld [vmem:[#allocation8 + $0x664] ss:$16 sps:$4 sm:$0xff]  }
 0x230   :  { %2842 = vmatpush1.bf16.msra.mxu1 %v4129_v11  ;;  %2679 = vmatprep.subr.bf16.mxu0 %v4134_v28  ;;  %v4221_v11 = vld [vmem:[#allocation8 + $0x66c] ss:$16 sps:$4 sm:$0xff]   ;;  %v4216_v28 = vld [vmem:[#allocation8 + $0x660] ss:$16 sps:$4 sm:$0xff]  }
 0x231   :  { %2843 = vmatprep.subr.bf16.mxu1 %v4137_v36  ;;  %v4219_v36 = vld [vmem:[#allocation8 + $0x668] ss:$16 sps:$4 sm:$0xff]  }
 0x233   :  { %2680 = vmatpush1.bf16.msra.mxu0 %v4132_v39  ;;  %v4224_v39 = vld [vmem:[#allocation8 + $0x684] ss:$16 sps:$4 sm:$0xff]  }
 0x234   :  { %2844 = vmatpush1.bf16.msra.mxu1 %v4135_v38  ;;  %2681 = vmatprep.subr.bf16.mxu0 %v4140_v59  ;;  %v4227_v38 = vld [vmem:[#allocation8 + $0x68c] ss:$16 sps:$4 sm:$0xff]   ;;  %v4222_v59 = vld [vmem:[#allocation8 + $0x680] ss:$16 sps:$4 sm:$0xff]  }
 0x235   :  { %2845 = vmatprep.subr.bf16.mxu1 %v4143_v0  ;;  %v4225_v0 = vld [vmem:[#allocation8 + $0x688] ss:$16 sps:$4 sm:$0xff]  }
 0x237   :  { %2682 = vmatpush1.bf16.msra.mxu0 %v4138_v8  ;;  %v4230_v8 = vld [vmem:[#allocation8 + $0x6a4] ss:$16 sps:$4 sm:$0xff]  }
 0x238   :  { %2846 = vmatpush1.bf16.msra.mxu1 %v4141_v60  ;;  %2683 = vmatprep.subr.bf16.mxu0 %v4146_v5  ;;  %v4233_v60 = vld [vmem:[#allocation8 + $0x6ac] ss:$16 sps:$4 sm:$0xff]   ;;  %v4228_v5 = vld [vmem:[#allocation8 + $0x6a0] ss:$16 sps:$4 sm:$0xff]  }
 0x239   :  { %2847 = vmatprep.subr.bf16.mxu1 %v4149_v12  ;;  %v4231_v12 = vld [vmem:[#allocation8 + $0x6a8] ss:$16 sps:$4 sm:$0xff]  }
 0x23b   :  { %2684 = vmatpush1.bf16.msra.mxu0 %v4144_v62  ;;  %v4236_v62 = vld [vmem:[#allocation8 + $0x6c4] ss:$16 sps:$4 sm:$0xff]  }
 0x23c   :  { %2848 = vmatpush1.bf16.msra.mxu1 %v4147_v7  ;;  %2685 = vmatprep.subr.bf16.mxu0 %v4152_v3  ;;  %v4239_v7 = vld [vmem:[#allocation8 + $0x6cc] ss:$16 sps:$4 sm:$0xff]   ;;  %v4234_v3 = vld [vmem:[#allocation8 + $0x6c0] ss:$16 sps:$4 sm:$0xff]  }
 0x23d   :  { %2849 = vmatprep.subr.bf16.mxu1 %v4155_v4  ;;  %v4237_v4 = vld [vmem:[#allocation8 + $0x6c8] ss:$16 sps:$4 sm:$0xff]  }
 0x23f   :  { %2686 = vmatpush1.bf16.msra.mxu0 %v4150_v21  ;;  %v4242_v21 = vld [vmem:[#allocation8 + $0x6e4] ss:$16 sps:$4 sm:$0xff]  }
 0x240   :  { %2850 = vmatpush1.bf16.msra.mxu1 %v4153_v6  ;;  %2687 = vmatprep.subr.bf16.mxu0 %v4158_v9  ;;  %v4245_v6 = vld [vmem:[#allocation8 + $0x6ec] ss:$16 sps:$4 sm:$0xff]   ;;  %v4240_v9 = vld [vmem:[#allocation8 + $0x6e0] ss:$16 sps:$4 sm:$0xff]  }
 0x241   :  { %2851 = vmatprep.subr.bf16.mxu1 %v4161_v16  ;;  %v4243_v16 = vld [vmem:[#allocation8 + $0x6e8] ss:$16 sps:$4 sm:$0xff]  }
 0x243   :  { %2688 = vmatpush1.bf16.msra.mxu0 %v4156_v10  ;;  %v4248_v10 = vld [vmem:[#allocation8 + $0x704] ss:$16 sps:$4 sm:$0xff]  }
 0x244   :  { %2852 = vmatpush1.bf16.msra.mxu1 %v4159_v20  ;;  %2689 = vmatprep.subr.bf16.mxu0 %v4164_v13  ;;  %v4251_v20 = vld [vmem:[#allocation8 + $0x70c] ss:$16 sps:$4 sm:$0xff]   ;;  %v4246_v13 = vld [vmem:[#allocation8 + $0x700] ss:$16 sps:$4 sm:$0xff]  }
 0x245   :  { %2853 = vmatprep.subr.bf16.mxu1 %v4167_v14  ;;  %v4249_v14 = vld [vmem:[#allocation8 + $0x708] ss:$16 sps:$4 sm:$0xff]  }
 0x247   :  { %2690 = vmatpush1.bf16.msra.mxu0 %v4162_v15  ;;  %v4254_v15 = vld [vmem:[#allocation8 + $0x724] ss:$16 sps:$4 sm:$0xff]  }
 0x248   :  { %2854 = vmatpush1.bf16.msra.mxu1 %v4165_v17  ;;  %2691 = vmatprep.subr.bf16.mxu0 %v4170_v18  ;;  %v4257_v17 = vld [vmem:[#allocation8 + $0x72c] ss:$16 sps:$4 sm:$0xff]   ;;  %v4252_v18 = vld [vmem:[#allocation8 + $0x720] ss:$16 sps:$4 sm:$0xff]  }
 0x249   :  { %2855 = vmatprep.subr.bf16.mxu1 %v4173_v19  ;;  %v4255_v19 = vld [vmem:[#allocation8 + $0x728] ss:$16 sps:$4 sm:$0xff]  }
 0x24b   :  { %2692 = vmatpush1.bf16.msra.mxu0 %v4168_v33  ;;  %v4260_v33 = vld [vmem:[#allocation8 + $0x744] ss:$16 sps:$4 sm:$0xff]  }
 0x24c   :  { %2856 = vmatpush1.bf16.msra.mxu1 %v4171_v30  ;;  %2693 = vmatprep.subr.bf16.mxu0 %v4176_v34  ;;  %v4263_v30 = vld [vmem:[#allocation8 + $0x74c] ss:$16 sps:$4 sm:$0xff]   ;;  %v4258_v34 = vld [vmem:[#allocation8 + $0x740] ss:$16 sps:$4 sm:$0xff]  }
 0x24d   :  { %2857 = vmatprep.subr.bf16.mxu1 %v4179_v27  ;;  %v4261_v27 = vld [vmem:[#allocation8 + $0x748] ss:$16 sps:$4 sm:$0xff]  }
 0x24f   :  { %2694 = vmatpush1.bf16.msra.mxu0 %v4174_v25  ;;  %v4266_v25 = vld [vmem:[#allocation8 + $0x764] ss:$16 sps:$4 sm:$0xff]  }
 0x250   :  { %2858 = vmatpush1.bf16.msra.mxu1 %v4177_v31  ;;  %2695 = vmatprep.subr.bf16.mxu0 %v4182_v29  ;;  %v4269_v31 = vld [vmem:[#allocation8 + $0x76c] ss:$16 sps:$4 sm:$0xff]   ;;  %v4264_v29 = vld [vmem:[#allocation8 + $0x760] ss:$16 sps:$4 sm:$0xff]  }
 0x251   :  { %2859 = vmatprep.subr.bf16.mxu1 %v4185_v35  ;;  %v4267_v35 = vld [vmem:[#allocation8 + $0x768] ss:$16 sps:$4 sm:$0xff]  }
 0x253   :  { %2696 = vmatpush1.bf16.msra.mxu0 %v4180_v37  ;;  %v4272_v37 = vld [vmem:[#allocation8 + $0x784] ss:$16 sps:$4 sm:$0xff]  }
 0x254   :  { %2860 = vmatpush1.bf16.msra.mxu1 %v4183_v40  ;;  %2697 = vmatprep.subr.bf16.mxu0 %v4188_v41  ;;  %v4275_v40 = vld [vmem:[#allocation8 + $0x78c] ss:$16 sps:$4 sm:$0xff]   ;;  %v4270_v41 = vld [vmem:[#allocation8 + $0x780] ss:$16 sps:$4 sm:$0xff]  }
 0x255   :  { %2861 = vmatprep.subr.bf16.mxu1 %v4191_v42  ;;  %v4273_v42 = vld [vmem:[#allocation8 + $0x788] ss:$16 sps:$4 sm:$0xff]  }
 0x257   :  { %2698 = vmatpush1.bf16.msra.mxu0 %v4186_v43  ;;  %v4278_v43 = vld [vmem:[#allocation8 + $0x7a4] ss:$16 sps:$4 sm:$0xff]  }
 0x258   :  { %2862 = vmatpush1.bf16.msra.mxu1 %v4189_v44  ;;  %2699 = vmatprep.subr.bf16.mxu0 %v4194_v45  ;;  %v4281_v44 = vld [vmem:[#allocation8 + $0x7ac] ss:$16 sps:$4 sm:$0xff]   ;;  %v4276_v45 = vld [vmem:[#allocation8 + $0x7a0] ss:$16 sps:$4 sm:$0xff]  }
 0x259   :  { %2863 = vmatprep.subr.bf16.mxu1 %v4197_v46  ;;  %v4279_v46 = vld [vmem:[#allocation8 + $0x7a8] ss:$16 sps:$4 sm:$0xff]  }
 0x25b   :  { %2700 = vmatpush1.bf16.msra.mxu0 %v4192_v47  ;;  %v4284_v47 = vld [vmem:[#allocation8 + $0x7c4] ss:$16 sps:$4 sm:$0xff]  }
 0x25c   :  { %2864 = vmatpush1.bf16.msra.mxu1 %v4195_v48  ;;  %2710 = vmatprep.subr.bf16.mxu0 %v4200_v50  ;;  %v4287_v48 = vld [vmem:[#allocation8 + $0x7cc] ss:$16 sps:$4 sm:$0xff]   ;;  %v4285_v50 = vld [vmem:[#allocation8 + $0x7c8] ss:$16 sps:$4 sm:$0xff]  }
 0x25d   :  { %2874 = vmatprep.subr.bf16.mxu1 %v4203_v52  ;;  %v4290_v52 = vld [vmem:[#allocation8 + $0x7e4] ss:$16 sps:$4 sm:$0xff]  }
 0x25e   :  { %2702 = vmatmul.mubr.bf16.vlgmr.msra.gmra.mrb[8].mxu0 %v1047_v63 }
 0x25f   :  { %2866 = vmatmul.mubr.bf16.vlgmr.msra.gmra.mrb[8].mxu1 %v1047_v63  ;;  %2711 = vmatpush1.bf16.msra.mxu0 %v4198_v51  ;;  %v4288_v51 = vld [vmem:[#allocation8 + $0x7e0] ss:$16 sps:$4 sm:$0xff]   ;;  %v4291_v63 = vld [vmem:[#allocation8 + $0x7e8] ss:$16 sps:$4 sm:$0xff]  }
 0x260   :  { %2742 = vmatprep.mubr.bf16.mxu0 %v1050_v55  ;;  %2875 = vmatpush1.bf16.msra.mxu1 %v4201_v53  ;;  %v1041_v53 = vmax.f32 %v4815_v26, 0.0  ;;  %v4302_v26 = vld [vmem:[#allocation10 + $0x50] sm:$0xff]  }
 0x261   :  { %2906 = vmatprep.mubr.bf16.mxu1 %v1050_v55  ;;  %2712 = vmatprep.subr.bf16.mxu0 %v4206_v54  ;;  %v4294_v54 = vld [vmem:[#allocation10 + $0x40] sm:$0xff]  }
 0x262   :  { %2876 = vmatprep.subr.bf16.mxu1 %v4209_v56  ;;  %v4295_v55 = vld [vmem:[#allocation10 + $0xc0] sm:$0xff]  }
 0x263   :  { %2713 = vmatpush1.bf16.msra.mxu0 %v4204_v57  ;;  %v4296_v56 = vld [vmem:[#allocation10] sm:$0xff]   ;;  %v1049_v57 = vpack.c.bf16 %v1041_v53, %v1041_v53 }
 0x264   :  { %2877 = vmatpush1.bf16.msra.mxu1 %v4207_v23  ;;  %2714 = vmatprep.subr.bf16.mxu0 %v4212_v61  ;;  %v4297_v23 = vld [vmem:[#allocation10 + $0x80] sm:$0xff]   ;;  %v4298_v61 = vld [vmem:[#allocation10 + $0x48] sm:$0xff]  }
 0x265   :  { %2878 = vmatprep.subr.bf16.mxu1 %v4215_v24  ;;  %v4299_v24 = vld [vmem:[#allocation10 + $0xc8] sm:$0xff]  }
 0x267   :  { %2715 = vmatpush1.bf16.msra.mxu0 %v4210_v58  ;;  %v4300_v58 = vld [vmem:[#allocation10 + $0x8] sm:$0xff]  }
 0x268   :  { %2879 = vmatpush1.bf16.msra.mxu1 %v4213_v2  ;;  %2716 = vmatprep.subr.bf16.mxu0 %v4218_v1  ;;  %v4301_v2 = vld [vmem:[#allocation10 + $0x88] sm:$0xff]   ;;  %v4303_v1 = vld [vmem:[#allocation10 + $0xd0] sm:$0xff]  }
 0x269   :  { %2880 = vmatprep.subr.bf16.mxu1 %v4221_v11  ;;  %v4304_v11 = vld [vmem:[#allocation10 + $0x10] sm:$0xff]  }
 0x26b   :  { %2717 = vmatpush1.bf16.msra.mxu0 %v4216_v28  ;;  %v4305_v28 = vld [vmem:[#allocation10 + $0x90] sm:$0xff]  }
 0x26c   :  { %2881 = vmatpush1.bf16.msra.mxu1 %v4219_v36  ;;  %2718 = vmatprep.subr.bf16.mxu0 %v4224_v39  ;;  %v4306_v36 = vld [vmem:[#allocation10 + $0x58] sm:$0xff]  }
 0x26d   :  { %2882 = vmatprep.subr.bf16.mxu1 %v4227_v38  ;;  %v4307_v39 = vld [vmem:[#allocation10 + $0xd8] sm:$0xff]  }
 0x26e   :  { %v4308_v38 = vld [vmem:[#allocation10 + $0x18] sm:$0xff]  }
 0x26f   :  { %2719 = vmatpush1.bf16.msra.mxu0 %v4222_v59  ;;  %v4309_v59 = vld [vmem:[#allocation10 + $0x98] sm:$0xff]  }
 0x270   :  { %2883 = vmatpush1.bf16.msra.mxu1 %v4225_v0  ;;  %2720 = vmatprep.subr.bf16.mxu0 %v4230_v8  ;;  %v4310_v0 = vld [vmem:[#allocation10 + $0x60] sm:$0xff]  }
 0x271   :  { %2884 = vmatprep.subr.bf16.mxu1 %v4233_v60  ;;  %v4311_v8 = vld [vmem:[#allocation10 + $0xe0] sm:$0xff]  }
 0x272   :  { %v4312_v60 = vld [vmem:[#allocation10 + $0x20] sm:$0xff]  }
 0x273   :  { %2721 = vmatpush1.bf16.msra.mxu0 %v4228_v5  ;;  %v4313_v5 = vld [vmem:[#allocation10 + $0xa0] sm:$0xff]  }
 0x274   :  { %2885 = vmatpush1.bf16.msra.mxu1 %v4231_v12  ;;  %2722 = vmatprep.subr.bf16.mxu0 %v4236_v62  ;;  %v4314_v12 = vld [vmem:[#allocation10 + $0x68] sm:$0xff]  }
 0x275   :  { %2886 = vmatprep.subr.bf16.mxu1 %v4239_v7  ;;  %v4315_v62 = vld [vmem:[#allocation10 + $0xe8] sm:$0xff]  }
 0x276   :  { %v4316_v7 = vld [vmem:[#allocation10 + $0x28] sm:$0xff]  }
 0x277   :  { %2723 = vmatpush1.bf16.msra.mxu0 %v4234_v3  ;;  %v4317_v3 = vld [vmem:[#allocation10 + $0xa8] sm:$0xff]  }
 0x278   :  { %2887 = vmatpush1.bf16.msra.mxu1 %v4237_v4  ;;  %2724 = vmatprep.subr.bf16.mxu0 %v4242_v21  ;;  %v4318_v4 = vld [vmem:[#allocation10 + $0x70] sm:$0xff]  }
 0x279   :  { %2888 = vmatprep.subr.bf16.mxu1 %v4245_v6  ;;  %v4319_v21 = vld [vmem:[#allocation10 + $0xf0] sm:$0xff]  }
 0x27a   :  { %v4320_v6 = vld [vmem:[#allocation10 + $0x30] sm:$0xff]  }
 0x27b   :  { %2725 = vmatpush1.bf16.msra.mxu0 %v4240_v9  ;;  %v4321_v9 = vld [vmem:[#allocation10 + $0xb0] sm:$0xff]  }
 0x27c   :  { %2889 = vmatpush1.bf16.msra.mxu1 %v4243_v16  ;;  %2726 = vmatprep.subr.bf16.mxu0 %v4248_v10  ;;  %v4322_v16 = vld [vmem:[#allocation10 + $0x78] sm:$0xff]  }
 0x27d   :  { %2890 = vmatprep.subr.bf16.mxu1 %v4251_v20  ;;  %v4323_v10 = vld [vmem:[#allocation10 + $0xf8] sm:$0xff]  }
 0x27e   :  { %v4324_v20 = vld [vmem:[#allocation10 + $0x38] sm:$0xff]  }
 0x27f   :  { %2727 = vmatpush1.bf16.msra.mxu0 %v4246_v13  ;;  %v4325_v13 = vld [vmem:[#allocation10 + $0xb8] sm:$0xff]  }
 0x280   :  { %2891 = vmatpush1.bf16.msra.mxu1 %v4249_v14  ;;  %2728 = vmatprep.subr.bf16.mxu0 %v4254_v15 }
 0x281   :  { %2892 = vmatprep.subr.bf16.mxu1 %v4257_v17 }
 0x283   :  { %2729 = vmatpush1.bf16.msra.mxu0 %v4252_v18 }
 0x284   :  { %2893 = vmatpush1.bf16.msra.mxu1 %v4255_v19  ;;  %2730 = vmatprep.subr.bf16.mxu0 %v4260_v33 }
 0x285   :  { %2894 = vmatprep.subr.bf16.mxu1 %v4263_v30 }
 0x287   :  { %2731 = vmatpush1.bf16.msra.mxu0 %v4258_v34 }
 0x288   :  { %2895 = vmatpush1.bf16.msra.mxu1 %v4261_v27  ;;  %2732 = vmatprep.subr.bf16.mxu0 %v4266_v25 }
 0x289   :  { %2896 = vmatprep.subr.bf16.mxu1 %v4269_v31 }
 0x28b   :  { %2733 = vmatpush1.bf16.msra.mxu0 %v4264_v29 }
 0x28c   :  { %2897 = vmatpush1.bf16.msra.mxu1 %v4267_v35  ;;  %2734 = vmatprep.subr.bf16.mxu0 %v4272_v37  ;;  %v4326_v35 = vld [vmem:[#allocation11] sm:$0xff]   ;;  %v4554_v37 = vmov 0.0  }
 0x28d   :  { %2898 = vmatprep.subr.bf16.mxu1 %v4275_v40  ;;  %v4327_v40 = vld [vmem:[#allocation11 + $0x8] sm:$0xff]  }
 0x28f   :  { %2735 = vmatpush1.bf16.msra.mxu0 %v4270_v41  ;;  %v4328_v41 = vld [vmem:[#allocation11 + $0x10] sm:$0xff]  }
 0x290   :  { %2899 = vmatpush1.bf16.msra.mxu1 %v4273_v42  ;;  %2736 = vmatprep.subr.bf16.mxu0 %v4278_v43  ;;  %v4329_v42 = vld [vmem:[#allocation11 + $0x18] sm:$0xff]   ;;  %v4330_v43 = vld [vmem:[#allocation11 + $0x20] sm:$0xff]  }
 0x291   :  { %2900 = vmatprep.subr.bf16.mxu1 %v4281_v44  ;;  %v4331_v44 = vld [vmem:[#allocation11 + $0x28] sm:$0xff]  }
 0x293   :  { %2737 = vmatpush1.bf16.msra.mxu0 %v4276_v45  ;;  %v4332_v45 = vld [vmem:[#allocation11 + $0x30] sm:$0xff]  }
 0x294   :  { %2901 = vmatpush1.bf16.msra.mxu1 %v4279_v46  ;;  %2738 = vmatprep.subr.bf16.mxu0 %v4284_v47  ;;  %v4333_v46 = vld [vmem:[#allocation11 + $0x38] sm:$0xff]  }
 0x295   :  { %2902 = vmatprep.subr.bf16.mxu1 %v4287_v48 }
 0x297   :  { %2739 = vmatpush1.bf16.msra.mxu0 %v4282_v49 }
 0x298   :  { %2903 = vmatpush1.bf16.msra.mxu1 %v4285_v50  ;;  %2740 = vmatprep.subr.bf16.mxu0 %v4290_v52 }
 0x299   :  { %2904 = vmatprep.subr.bf16.mxu1 %v4293_v22 }
 0x29b   :  { %2741 = vmatpush1.bf16.msra.mxu0 %v4288_v51 }
 0x29c   :  { %2905 = vmatpush1.bf16.msra.mxu1 %v4291_v63  ;;  %3795 = vmatprep.subr.bf16.mxu0 %v4294_v54 }
 0x29d   :  { %3817 = vmatprep.subr.bf16.mxu1 %v4295_v55 }
 0x29e   :  { %2743 = vmatmul.mubr.bf16.vlgmr.msra.gmra.mrb[8].mxu0 %v1049_v57 }
 0x29f   :  { %2907 = vmatmul.mubr.bf16.vlgmr.msra.gmra.mrb[8].mxu1 %v1049_v57  ;;  %3796 = vmatpush3.bf16.msra.mxu0 %v4296_v56 }
 0x2a0   :  { %3818 = vmatpush3.bf16.msra.mxu1 %v4297_v23  ;;  %3797 = vmatprep.subr.bf16.mxu0 %v4298_v61 }
 0x2a1   :  { %3819 = vmatprep.subr.bf16.mxu1 %v4299_v24 }
 0x2a3   :  { %3798 = vmatpush3.bf16.msra.mxu0 %v4300_v58 }
 0x2a4   :  { %3820 = vmatpush3.bf16.msra.mxu1 %v4301_v2  ;;  %3799 = vmatprep.subr.bf16.mxu0 %v4302_v26 }
 0x2a5   :  { %3821 = vmatprep.subr.bf16.mxu1 %v4303_v1 }
 0x2a7   :  { %3800 = vmatpush3.bf16.msra.mxu0 %v4304_v11 }
 0x2a8   :  { %3822 = vmatpush3.bf16.msra.mxu1 %v4305_v28  ;;  %3801 = vmatprep.subr.bf16.mxu0 %v4306_v36 }
 0x2a9   :  { %3823 = vmatprep.subr.bf16.mxu1 %v4307_v39 }
 0x2ab   :  { %3802 = vmatpush3.bf16.msra.mxu0 %v4308_v38 }
 0x2ac   :  { %3824 = vmatpush3.bf16.msra.mxu1 %v4309_v59  ;;  %3803 = vmatprep.subr.bf16.mxu0 %v4310_v0 }
 0x2ad   :  { %3825 = vmatprep.subr.bf16.mxu1 %v4311_v8 }
 0x2af   :  { %3804 = vmatpush3.bf16.msra.mxu0 %v4312_v60  ;;  %v3259_v60 = vld [vmem:[%s4860_s6] sm:$0x1]  ;;  %s4484_s6 = scalar_lea.vmem %s3410_s29, 512 }
 0x2b0   :  { %3826 = vmatpush3.bf16.msra.mxu1 %v4313_v5  ;;  %3805 = vmatprep.subr.bf16.mxu0 %v4314_v12  ;;  %p4485_p6 = scmp.ne.s32.totalorder %s3410_s29, %s4484_s6  ;;  %p4490_p8 = scmp.lt.s32.totalorder %s4484_s6, %s4484_s6 }
 0x2b1   :  { %3827 = vmatprep.subr.bf16.mxu1 %v4315_v62  ;;  %v3260_v62 = vld [vmem:[%s4861_s7] sm:$0x1] }
 0x2b2   :  { %p4491_p9 = por %p4490_p8, %p4489_p7 }
 0x2b3   :  { %3806 = vmatpush3.bf16.msra.mxu0 %v4316_v7 }
 0x2b4   :  { %3828 = vmatpush3.bf16.msra.mxu1 %v4317_v3  ;;  %3807 = vmatprep.subr.bf16.mxu0 %v4318_v4  ;;  %p4492_p10 = pnand %p4491_p9, %p4485_p6 }
 0x2b5   :  { %3829 = vmatprep.subr.bf16.mxu1 %v4319_v21 }
 0x2b7   :  { %3808 = vmatpush3.bf16.msra.mxu0 %v4320_v6 }
 0x2b8   :  { %3830 = vmatpush3.bf16.msra.mxu1 %v4321_v9  ;;  %3809 = vmatprep.subr.bf16.mxu0 %v4322_v16 }
 0x2b9   :  { %3831 = vmatprep.subr.bf16.mxu1 %v4323_v10 }
 0x2bb   :  { %3810 = vmatpush3.bf16.msra.mxu0 %v4324_v20 }
 0x2bc   :  { %3832 = vmatpush3.bf16.msra.mxu1 %v4325_v13  ;;  %3848 = vmatprep.subr.bf16.mxu0 %v4554_v37 }
 0x371   :  { %v2744_v14 = vpop.f32.mrb[8].mxu0 }
 0x372   :  { %2915 = vst [vmem:[#allocation13] sm:$0xff] %v2744_v14  ;;  %v2908_v15 = vpop.f32.mrb[8].mxu1  ;;  %v2746_v17 = vpop.f32.mrb[9].mxu0  ;;  %v2919_v30 = vpack.c.bf16 %v2744_v14, %v2744_v14 }
 0x373   :  { %2917 = vst [vmem:[#allocation13 + $0x10] sm:$0xff] %v2908_v15  ;;  %2916 = vst [vmem:[#allocation13 + $0x8] sm:$0xff] %v2746_v17  ;;  %v2920_v18 = vpack.c.bf16 %v2746_v17, %v2746_v17  ;;  %v2910_v19 = vpop.f32.mrb[9].mxu1  ;;  %v2748_v33 = vpop.f32.mrb[10].mxu0  ;;  %v2921_v31 = vpack.c.bf16 %v2908_v15, %v2908_v15 }
 0x374   :  { %2918 = vst [vmem:[#allocation13 + $0x18] sm:$0xff] %v2910_v19  ;;  %v2922_v34 = vpack.c.bf16 %v2910_v19, %v2910_v19  ;;  %v2912_v27 = vpop.f32.mrb[10].mxu1  ;;  %v2749_v25 = vpop.f32.mrb[11].mxu0 }
 0x375   :  { %v2913_v29 = vpop.f32.mrb[11].mxu1  ;;  %3211 = vmatprep.mubr.bf16.mxu0 %v2920_v18 }
 0x376   :  { %3251 = vmatprep.mubr.bf16.mxu1 %v2922_v34  ;;  %3212 = vmatmul.mubr.bf16.vlgmr.msra.gmra.mrb[12].mxu0 %v2919_v30 }
 0x377   :  { %3252 = vmatmul.mubr.bf16.vlgmr.msra.gmra.mrb[12].mxu1 %v2921_v31  ;;  %3849 = vmatpush3.bf16.msra.mxu0 %v4326_v35 }
 0x378   :  { %3850 = vmatprep.subr.bf16.mxu0 %v4554_v37  ;;  %3864 = vmatprep.mubr.msk.bf16.mxu0 %vm4555_vm0, %v4554_v37 }
 0x37b   :  { %3851 = vmatpush3.bf16.msra.mxu0 %v4327_v40 }
 0x37c   :  { %3852 = vmatprep.subr.bf16.mxu0 %v4554_v37 }
 0x37f   :  { %3853 = vmatpush3.bf16.msra.mxu0 %v4328_v41 }
 0x380   :  { %3854 = vmatprep.subr.bf16.mxu0 %v4554_v37 }
 0x383   :  { %3855 = vmatpush3.bf16.msra.mxu0 %v4329_v42 }
 0x384   :  { %3856 = vmatprep.subr.bf16.mxu0 %v4554_v37 }
 0x387   :  { %3857 = vmatpush3.bf16.msra.mxu0 %v4330_v43 }
 0x388   :  { %3858 = vmatprep.subr.bf16.mxu0 %v4554_v37 }
 0x38b   :  { %3859 = vmatpush3.bf16.msra.mxu0 %v4331_v44 }
 0x38c   :  { %3860 = vmatprep.subr.bf16.mxu0 %v4554_v37 }
 0x38f   :  { %3861 = vmatpush3.bf16.msra.mxu0 %v4332_v45 }
 0x390   :  { %3862 = vmatprep.subr.bf16.mxu0 %v4554_v37 }
 0x393   :  { %3863 = vmatpush3.bf16.msra.mxu0 %v4333_v46 }
 0x449   :  { %v3811_v47 = vpop.f32.mrb[12].mxu0 }
 0x44a   :  { %v3833_v48 = vpop.f32.mrb[12].mxu1  ;;  %v3812_v49 = vpop.f32.mrb[13].mxu0 }
 0x44b   :  { %v3813_v50 = vadd.f32 %v3812_v49, %v3811_v47  ;;  %v3834_v52 = vpop.f32.mrb[13].mxu1  ;;  %v3814_v22 = vpop.f32.mrb[14].mxu0 }
 0x44c   :  { %v3835_v51 = vadd.f32 %v3834_v52, %v3833_v48  ;;  %v3836_v63 = vpop.f32.mrb[14].mxu1  ;;  %v3815_v53 = vpop.f32.mrb[15].mxu0 }
 0x44d   :  { %v3837_v54 = vpop.f32.mrb[15].mxu1 }
 0x44e   :  { %v3254_v55 = vadd.f32 %v3835_v51, %v3813_v50 }
 0x450   :  { %v3261_v56 = vrot.slane %v3254_v55, 4 }
 0x452   :  { %v3262_v57 = vadd.f32 %v3261_v56, %v3254_v55 }
 0x454   :  { %v3263_v23 = vrot.slane %v3262_v57, 2 }
 0x456   :  { %v3264_v61 = vadd.f32 %v3263_v23, %v3262_v57 }
 0x458   :  { %v3265_v24 = vrot.slane %v3264_v61, 1 }
 0x45a   :  { %v3266_v58 = vadd.f32 %v3265_v24, %v3264_v61 }
 0x45c   :  { %v3267_v2 = vmul.f32 0.125, %v3266_v58 }
 0x45e   :  { %v3268_v26 = vsub.f32 %v3254_v55, %v3267_v2 }
 0x460   :  { %v3269_v1 = vmul.f32 %v3268_v26, %v3268_v26 }
 0x462   :  { %v3270_v11 = vrot.slane %v3269_v1, 4 }
 0x464   :  { %v3271_v28 = vadd.f32 %v3270_v11, %v3269_v1 }
 0x466   :  { %v3272_v36 = vrot.slane %v3271_v28, 2 }
 0x468   :  { %v3273_v39 = vadd.f32 %v3272_v36, %v3271_v28 }
 0x46a   :  { %v3274_v38 = vrot.slane %v3273_v39, 1 }
 0x46c   :  { %v3275_v59 = vadd.f32 %v3274_v38, %v3273_v39 }
 0x46e   :  { %v3276_v0 = vmul.f32 0.125, %v3275_v59 }
 0x470   :  { %v3277_v8 = vadd.f32 1e-05, %v3276_v0 }
 0x472   :  { %4350 = vrsqrt.f32 %v3277_v8 }
 0x47c   :  { %v4351_v5 = vpop.eup %4350 }
 0x47d   :  { %v3279_v12 = vmul.f32 %v4351_v5, %v3259_v60 }
 0x47f   :  { %v3280_v7 = vmul.f32 %v3279_v12, %v3267_v2  ;;  %v3286_v3 = vrot.slane %v3279_v12, %v4775_v32 }
 0x481   :  { %v3281_v4 = vsub.f32 %v3260_v62, %v3280_v7  ;;  %v3288_v21 = vmul.f32 %v3286_v3, %v3254_v55 }
 0x483   :  { %v3293_v6 = vrot.slane %v3281_v4, %v4775_v32 }
 0x485   :  { %v3295_v9 = vadd.f32 %v3293_v6, %v3288_v21 }
 0x487   :  { %v3296_v16 = vmax.f32 %v3295_v9, 0.0 }
 0x489   :  { %v3297_v10 = vpack.c.bf16 %v3296_v16, %v3296_v16 }
 0x48b   :  { %3865 = vmatmul.mubr.bf16.vlgmr.msra.gmra.mrb[16].mxu0 %v3297_v10 }
 0x48c   :  { %4495 = shalt.err (!%p4492_p10)
}
 0x48d   :  { %s4496_s11 = scalar_lea.hbm %s4863_s9, 512 }
 0x48e   :  { %p4497_p11 = scmp.ne.s32.totalorder %s4863_s9, %s4496_s11  ;;  %p4500_p12 = scmp.lt.u32.totalorder %s4496_s11, %s4863_s9 }
 0x490   :  { %p4502_p13 = pnand %p4500_p12, %p4497_p11 }
 0x492   :  { %4505 = shalt.err (!%p4502_p13)
}
 0x493   :  { %3412 = dma.vmem_to_hbm [thread:$0]  %s3410_s29, 512, %s4863_s9, [#allocation4]  }
 0x494   :  { %s4557_s15 = smov [#allocation14]  }
 0x495   :  { %s3419_s16 = sshll.u32 %s4557_s15, 4  ;;  %s3420_s16 = int_to_ptr.vmem [resolvable:$true] %s3419_s16 }
 0x496   :  { %s4506_s17 = scalar_lea.vmem %s3420_s16, 128  ;;  %p4511_p1 = scmp.lt.s32.totalorder %s3420_s16, %s3420_s16 }
 0x497   :  { %p4507_p0 = scmp.ne.s32.totalorder %s3420_s16, %s4506_s17  ;;  %p4512_p2 = scmp.lt.s32.totalorder %s4506_s17, %s4506_s17 }
 0x499   :  { %p4513_p3 = por %p4512_p2, %p4511_p1 }
 0x49b   :  { %p4514_p4 = pnand %p4513_p3, %p4507_p0 }
 0x55e   :  { %v3396_v32 = vpop.f32.mrb[16].mxu0 }
 0x55f   :  { %3402 = vst [vmem:[#allocation14] sm:$0xff] %v3396_v32  ;;  %v3866_v20 = vpop.f32.mrb[17].mxu0 }
 0x560   :  { %v3399_v13 = vpop.f32.mrb[18].mxu0 }
 0x561   :  { %4517 = shalt.err (!%p4514_p4)
}
 0x562   :  { %s4518_s18 = scalar_lea.hbm %s4864_s10, 128 }
 0x563   :  { %p4519_p5 = scmp.ne.s32.totalorder %s4864_s10, %s4518_s18  ;;  %p4522_p6 = scmp.lt.u32.totalorder %s4518_s18, %s4864_s10 }
 0x565   :  { %p4524_p7 = pnand %p4522_p6, %p4519_p5 }
 0x567   :  { %4527 = shalt.err (!%p4524_p7)
}
 0x568   :  { %3422 = dma.vmem_to_hbm [thread:$0]  %s3420_s16, 128, %s4864_s10, [#allocation15]   ;;  %v3867_v14 = vpop.f32.mrb[19].mxu0 }
 0x569   :  { %4536 = dma.done.wait [#allocation4], 512  }
 0x56a   :  { %4537 = vsyncadd [#allocation4], 4294966784 }
 0x56b   :  { %4538 = dma.done.wait [#allocation15], 128  }
 0x56c   :  { %4539 = vsyncadd [#allocation15], 4294967168 }
 0x56d   :  { %3429 = vsyncpa [#allocation3], 1 }
 0x56e   :  { %3430 = vsyncpa [#allocation6], 1 }
 0x56f   :  { %3431 = vsyncpa [#allocation9], 1 }
 0x570   :  { %3432 = vsyncpa [#allocation12], 1 }
 0x571   :  { %3433 = vsyncpa [#allocation4], 1 }
 0x572   :  { %3434 = vsyncpa [#allocation15], 1 }

</bundles_post_ra>
